<compile_context>
chip_gen: v7x
topology: tpu7x:2x2x1
jax: 0.10.0
libtpu: 0.0.40
codegen_flags: <defaults>
</compile_context>

<pallas_src>
import functools
import math

import jax
import jax.numpy as jnp
from jax import lax
from jax.experimental import pallas as pl
from jax.experimental.pallas import tpu as pltpu


# -----------------------------------------------------------------------------
# small math helpers
# -----------------------------------------------------------------------------
def _gelu_tanh(x):
    # GPT-2 tanh-approximate GELU; tanh lowers to the EUP slot.
    # NOTE: ~1e-3 deviation from PyTorch's exact erf GELU (accepted tolerance).
    c = 0.7978845608028654  # sqrt(2/pi)
    return 0.5 * x * (1.0 + jnp.tanh(c * (x + 0.044715 * x * x * x)))


def _layernorm(v, g, eps):
    mu = jnp.mean(v, axis=-1, keepdims=True)
    vc = v - mu
    var = jnp.mean(vc * vc, axis=-1, keepdims=True)
    return (vc * lax.rsqrt(var + eps)) * g


# -----------------------------------------------------------------------------
# The fused whole-model kernel. One grid step = one batch element through the
# entire network (all layers statically unrolled; L and H are small).
# -----------------------------------------------------------------------------
def _gpt_kernel(x_ref, cos_ref, sin_ref,
                ln1_ref, w_attn_ref, w_proj_ref,
                ln2_ref, w_fc1_ref, w_fc2_ref,
                lnf_ref, head_ref, o_ref, y_scr,
                *, n_layer, n_head, eps):
    x = x_ref[0]                                   # (T, C) f32 residual stream
    T, C = x.shape
    Dh = C // n_head
    d2 = Dh // 2
    scale = 1.0 / math.sqrt(Dh)                    # SDPA default scale

    cos = cos_ref[...]                             # (T, d2) f32
    sin = sin_ref[...]
    cos_q = cos * scale                            # fold score scale into q
    sin_q = sin * scale

    # causal mask from iota (no [T,T] mask DMA)
    row = lax.broadcasted_iota(jnp.int32, (T, T), 0)
    col = lax.broadcasted_iota(jnp.int32, (T, T), 1)
    causal = col <= row
    neg = jnp.float32(-1e30)                       # f32 scores: safe fill

    dn = (((1,), (1,)), ((), ()))                  # a @ b.T

    for l in range(n_layer):                       # static unroll (small L)
        # ---- attention sub-block: LN1 -> QKV -> RoPE -> SDPA -> proj -> +res
        xn = _layernorm(x, ln1_ref[l], eps)                          # (T, C)
        qkv = jnp.dot(xn.astype(jnp.bfloat16), w_attn_ref[l],
                      preferred_element_type=jnp.float32)            # (T, 3C)
        for h in range(n_head):                    # static unroll (small H)
            q = qkv[:, h * Dh:(h + 1) * Dh]
            k = qkv[:, C + h * Dh:C + (h + 1) * Dh]
            v = qkv[:, 2 * C + h * Dh:2 * C + (h + 1) * Dh]
            # q/k columns arrive RoPE de-interleaved (baked perm): [real|imag]
            q1, q2 = q[:, :d2], q[:, d2:]
            k1, k2 = k[:, :d2], k[:, d2:]
            qr = jnp.concatenate([q1 * cos_q - q2 * sin_q,
                                  q1 * sin_q + q2 * cos_q], axis=-1)  # scaled
            kr = jnp.concatenate([k1 * cos - k2 * sin,
                                  k1 * sin + k2 * cos], axis=-1)
            # single full-width (K=Dh) bf16 score matmul per head, f32 acc
            s = lax.dot_general(qr.astype(jnp.bfloat16),
                                kr.astype(jnp.bfloat16), dn,
                                preferred_element_type=jnp.float32)   # (T, T)
            s = jnp.where(causal, s, neg)
            m = jnp.max(s, axis=-1, keepdims=True)
            p = jnp.exp(s - m)
            p = p * pl.reciprocal(jnp.sum(p, axis=-1, keepdims=True),
                                  approx=True)
            # direct per-head store into the (T, C) VMEM scratch (no concat)
            y_scr[:, h * Dh:(h + 1) * Dh] = jnp.dot(
                p.astype(jnp.bfloat16), v.astype(jnp.bfloat16),
                preferred_element_type=jnp.float32)
        x = x + jnp.dot(y_scr[...].astype(jnp.bfloat16), w_proj_ref[l],
                        preferred_element_type=jnp.float32)           # +res

        # ---- MLP sub-block: LN2 -> FC1 -> GELU(tanh) -> FC2 -> +res
        xn2 = _layernorm(x, ln2_ref[l], eps)
        h1 = jnp.dot(xn2.astype(jnp.bfloat16), w_fc1_ref[l],
                     preferred_element_type=jnp.float32)              # (T, 4C)
        h1 = _gelu_tanh(h1)
        x = x + jnp.dot(h1.astype(jnp.bfloat16), w_fc2_ref[l],
                        preferred_element_type=jnp.float32)

    # ---- final LN + (weight-tied, pre-transposed) lm_head; lane-dense output
    xnf = _layernorm(x, lnf_ref[...], eps)
    o_ref[0] = jnp.dot(xnf.astype(jnp.bfloat16), head_ref[...],
                       preferred_element_type=jnp.float32).astype(o_ref.dtype)


# -----------------------------------------------------------------------------
# Model config / parameter setup (glue: gather + free reshapes only)
# -----------------------------------------------------------------------------
class Cfg:
    vocab_size = 256
    block_size = 16
    n_embd = 32
    n_head = 4
    n_layer = 2
    dropout = 0.0      # eval mode -> dropout is identity
    bias = False
    rope_base = 10000.0


def precompute_freqs(dim, seq_len, rope_base):
    thetas = rope_base ** (-jnp.arange(0, dim, 2, dtype=jnp.float32) / dim)
    t = jnp.arange(seq_len, dtype=jnp.float32)
    freqs = jnp.outer(t, thetas)                   # (seq_len, dim//2)
    return jnp.cos(freqs), jnp.sin(freqs)


def xavier(key, fan_in, fan_out):
    a = math.sqrt(6.0 / (fan_in + fan_out))
    return jax.random.uniform(key, (fan_in, fan_out), jnp.float32, -a, a)


def _rope_qk_perm(C, H):
    """Column permutation moving RoPE (even, odd) pairs into contiguous halves
    within each head; applied to the q and k sections of w_attn only."""
    Dh = C // H
    base = jnp.concatenate([jnp.arange(0, Dh, 2), jnp.arange(1, Dh, 2)])
    head_perm = jnp.concatenate([h * Dh + base for h in range(H)])
    return jnp.concatenate([head_perm, C + head_perm, 2 * C + jnp.arange(C)])


def init_params(cfg, key):
    C, H, L = cfg.n_embd, cfg.n_head, cfg.n_layer
    Dh = C // H
    keys = jax.random.split(key, 1 + 4 * L)
    a = math.sqrt(6.0 / (cfg.vocab_size + C))
    wte = jax.random.uniform(keys[0], (cfg.vocab_size, C), jnp.float32, -a, a)
    cos, sin = precompute_freqs(Dh, cfg.block_size, cfg.rope_base)
    perm = _rope_qk_perm(C, H)

    w_attn, w_proj, w_fc1, w_fc2 = [], [], [], []
    for l in range(L):
        k0, k1, k2, k3 = keys[1 + 4 * l: 5 + 4 * l]
        # weights stored [in, out] bf16; q/k RoPE permutation baked in
        w_attn.append(xavier(k0, C, 3 * C)[:, perm])
        w_proj.append(xavier(k1, C, C))
        w_fc1.append(xavier(k2, C, 4 * C))
        w_fc2.append(xavier(k3, 4 * C, C))

    # NOTE: weight tying is asymmetric by dtype: the embedding gather uses f32
    # wte while lm_head is a bf16 pre-transposed copy (documented tolerance).
    return {
        "wte": wte,                                             # f32 [V, C]
        "lm_head": wte.T.astype(jnp.bfloat16),                  # bf16 [C, V]
        "ln_w": jnp.ones((1, C), jnp.float32),
        "rope_cos": cos,                                        # [block, Dh/2]
        "rope_sin": sin,
        "ln1_w": jnp.ones((L, 1, C), jnp.float32),
        "ln2_w": jnp.ones((L, 1, C), jnp.float32),
        "w_attn": jnp.stack(w_attn).astype(jnp.bfloat16),       # [L, C, 3C]
        "w_proj": jnp.stack(w_proj).astype(jnp.bfloat16),       # [L, C, C]
        "w_fc1": jnp.stack(w_fc1).astype(jnp.bfloat16),         # [L, C, 4C]
        "w_fc2": jnp.stack(w_fc2).astype(jnp.bfloat16),         # [L, 4C, C]
    }


def gpt_forward(tokens, params, cfg):
    B, T = tokens.shape
    assert T <= cfg.block_size
    C, H, L, V = cfg.n_embd, cfg.n_head, cfg.n_layer, cfg.vocab_size
    Dh = C // H

    x = params["wte"][tokens]                      # (B, T, C) f32 gather (glue)
    cos = params["rope_cos"][:T]                   # input_pos=None path
    sin = params["rope_sin"][:T]

    # advisory cost estimate
    flops = B * (L * (24 * T * C * C + 4 * T * T * C) + 2 * T * C * V)
    trans = B * L * (H * T * T + 4 * T * C)
    w_bytes = 2 * (L * (12 * C * C) + C * V) + 4 * (2 * L * C + C)
    bytes_acc = B * T * C * 4 + B * T * V * 4 + w_bytes + T * Dh * 4

    kernel = functools.partial(_gpt_kernel, n_layer=L, n_head=H, eps=1e-5)
    logits = pl.pallas_call(
        kernel,
        out_shape=jax.ShapeDtypeStruct((B, T, V), jnp.float32),
        grid=(B,),
        in_specs=[
            pl.BlockSpec((1, T, C), lambda b: (b, 0, 0)),        # embeddings
            pl.BlockSpec((T, Dh // 2), lambda b: (0, 0)),        # rope cos
            pl.BlockSpec((T, Dh // 2), lambda b: (0, 0)),        # rope sin
            pl.BlockSpec((L, 1, C), lambda b: (0, 0, 0)),        # ln1 gamma
            pl.BlockSpec((L, C, 3 * C), lambda b: (0, 0, 0)),    # w_attn
            pl.BlockSpec((L, C, C), lambda b: (0, 0, 0)),        # w_proj
            pl.BlockSpec((L, 1, C), lambda b: (0, 0, 0)),        # ln2 gamma
            pl.BlockSpec((L, C, 4 * C), lambda b: (0, 0, 0)),    # w_fc1
            pl.BlockSpec((L, 4 * C, C), lambda b: (0, 0, 0)),    # w_fc2
            pl.BlockSpec((1, C), lambda b: (0, 0)),              # final ln gamma
            pl.BlockSpec((C, V), lambda b: (0, 0)),              # lm_head
        ],
        out_specs=pl.BlockSpec((1, T, V), lambda b: (b, 0, 0)),
        scratch_shapes=[pltpu.VMEM((T, C), jnp.float32)],        # per-head y
        compiler_params=pltpu.CompilerParams(
            dimension_semantics=("parallel",)),   # B across TCs on v7x
        cost_estimate=pl.CostEstimate(flops=int(flops),
                                      transcendentals=int(trans),
                                      bytes_accessed=int(bytes_acc)),
    )(x, cos, sin,
      params["ln1_w"], params["w_attn"], params["w_proj"],
      params["ln2_w"], params["w_fc1"], params["w_fc2"],
      params["ln_w"], params["lm_head"])
    return logits                                  # (B, T, V)


if __name__ == "__main__":
    cfg = Cfg()
    key = jax.random.PRNGKey(0)
    kp, kt = jax.random.split(key)
    params = init_params(cfg, kp)

    B, T = 2, 8
    tokens = jax.random.randint(kt, (B, T), 0, cfg.vocab_size, dtype=jnp.int32)

    fwd = jax.jit(lambda toks: gpt_forward(toks, params, cfg))
    logits = fwd(tokens)
    jax.block_until_ready(logits)
    assert logits.shape == (B, T, cfg.vocab_size)
    assert bool(jnp.all(jnp.isfinite(logits)))
    print("KERNEL_OK")
</pallas_src>

<mosaic_0001>
module attributes {stable_mosaic.version = 11 : i64} {
  func.func @_gpt_kernel(%arg0: i32, %arg1: memref<1x8x32xf32, #tpu.memory_space<vmem>>, %arg2: memref<8x4xf32, #tpu.memory_space<vmem>>, %arg3: memref<8x4xf32, #tpu.memory_space<vmem>>, %arg4: memref<2x1x32xf32, #tpu.memory_space<vmem>>, %arg5: memref<2x32x96xbf16, #tpu.memory_space<vmem>>, %arg6: memref<2x32x32xbf16, #tpu.memory_space<vmem>>, %arg7: memref<2x1x32xf32, #tpu.memory_space<vmem>>, %arg8: memref<2x32x128xbf16, #tpu.memory_space<vmem>>, %arg9: memref<2x128x32xbf16, #tpu.memory_space<vmem>>, %arg10: memref<1x32xf32, #tpu.memory_space<vmem>>, %arg11: memref<32x256xbf16, #tpu.memory_space<vmem>>, %arg12: memref<1x8x256xf32, #tpu.memory_space<vmem>>, %arg13: memref<8x32xf32, #tpu.memory_space<vmem>>) attributes {dimension_semantics = [#tpu.dimension_semantics<parallel>], iteration_bounds = array<i64: 2>, scalar_prefetch = 0 : i64, scratch_operands = 1 : i64, tpu.core_type = #tpu.core_type<tc>, window_params = [{transform_indices = @transform_0, window_bounds = array<i64: 1, 8, 32>}, {pipeline_mode = #tpu.pipeline_mode<synchronous>, transform_indices = @transform_1, window_bounds = array<i64: 8, 4>}, {pipeline_mode = #tpu.pipeline_mode<synchronous>, transform_indices = @transform_2, window_bounds = array<i64: 8, 4>}, {pipeline_mode = #tpu.pipeline_mode<synchronous>, transform_indices = @transform_3, window_bounds = array<i64: 2, 1, 32>}, {pipeline_mode = #tpu.pipeline_mode<synchronous>, transform_indices = @transform_4, window_bounds = array<i64: 2, 32, 96>}, {pipeline_mode = #tpu.pipeline_mode<synchronous>, transform_indices = @transform_5, window_bounds = array<i64: 2, 32, 32>}, {pipeline_mode = #tpu.pipeline_mode<synchronous>, transform_indices = @transform_6, window_bounds = array<i64: 2, 1, 32>}, {pipeline_mode = #tpu.pipeline_mode<synchronous>, transform_indices = @transform_7, window_bounds = array<i64: 2, 32, 128>}, {pipeline_mode = #tpu.pipeline_mode<synchronous>, transform_indices = @transform_8, window_bounds = array<i64: 2, 128, 32>}, {pipeline_mode = #tpu.pipeline_mode<synchronous>, transform_indices = @transform_9, window_bounds = array<i64: 1, 32>}, {pipeline_mode = #tpu.pipeline_mode<synchronous>, transform_indices = @transform_10, window_bounds = array<i64: 32, 256>}, {transform_indices = @transform_11, window_bounds = array<i64: 1, 8, 256>}]} {
    %c0 = arith.constant 0 : index
    %c0_0 = arith.constant 0 : index
    %c0_1 = arith.constant 0 : index
    %0 = vector.load %arg1[%c0, %c0_0, %c0_1] : memref<1x8x32xf32, #tpu.memory_space<vmem>>, vector<1x8x32xf32>
    %1 = vector.shape_cast %0 : vector<1x8x32xf32> to vector<8x32xf32>
    %c0_2 = arith.constant 0 : index
    %c0_3 = arith.constant 0 : index
    %2 = vector.load %arg2[%c0_2, %c0_3] : memref<8x4xf32, #tpu.memory_space<vmem>>, vector<8x4xf32>
    %c0_4 = arith.constant 0 : index
    %c0_5 = arith.constant 0 : index
    %3 = vector.load %arg3[%c0_4, %c0_5] : memref<8x4xf32, #tpu.memory_space<vmem>>, vector<8x4xf32>
    %cst = arith.constant 0.353553385 : f32
    %4 = vector.broadcast %cst : f32 to vector<8x4xf32>
    %5 = arith.mulf %2, %4 : vector<8x4xf32>
    %cst_6 = arith.constant 0.353553385 : f32
    %6 = vector.broadcast %cst_6 : f32 to vector<8x4xf32>
    %7 = arith.mulf %3, %6 : vector<8x4xf32>
    %8 = tpu.iota {dimensions = array<i32: 0>} : vector<8x8xi32>
    %9 = tpu.iota {dimensions = array<i32: 1>} : vector<8x8xi32>
    %10 = arith.cmpi sle, %9, %8 : vector<8x8xi32>
    %c0_7 = arith.constant 0 : index
    %c0_8 = arith.constant 0 : index
    %c0_9 = arith.constant 0 : index
    %11 = vector.load %arg4[%c0_7, %c0_8, %c0_9] : memref<2x1x32xf32, #tpu.memory_space<vmem>>, vector<1x1x32xf32>
    %12 = vector.shape_cast %11 : vector<1x1x32xf32> to vector<1x32xf32>
    %cst_10 = arith.constant dense<0.000000e+00> : vector<8xf32>
    %13 = vector.multi_reduction <add>, %1, %cst_10 [1] : vector<8x32xf32> to vector<8xf32>
    %14 = vector.shape_cast %13 : vector<8xf32> to vector<8x1xf32>
    %cst_11 = arith.constant 3.200000e+01 : f32
    %15 = vector.broadcast %cst_11 : f32 to vector<8x1xf32>
    %16 = arith.divf %14, %15 : vector<8x1xf32>
    %17 = vector.broadcast %16 : vector<8x1xf32> to vector<8x32xf32>
    %18 = arith.subf %1, %17 : vector<8x32xf32>
    %19 = arith.mulf %18, %18 : vector<8x32xf32>
    %cst_12 = arith.constant dense<0.000000e+00> : vector<8xf32>
    %20 = vector.multi_reduction <add>, %19, %cst_12 [1] : vector<8x32xf32> to vector<8xf32>
    %21 = vector.shape_cast %20 : vector<8xf32> to vector<8x1xf32>
    %cst_13 = arith.constant 3.200000e+01 : f32
    %22 = vector.broadcast %cst_13 : f32 to vector<8x1xf32>
    %23 = arith.divf %21, %22 : vector<8x1xf32>
    %cst_14 = arith.constant 9.99999974E-6 : f32
    %24 = vector.broadcast %cst_14 : f32 to vector<8x1xf32>
    %25 = arith.addf %23, %24 : vector<8x1xf32>
    %26 = math.rsqrt %25 : vector<8x1xf32>
    %27 = vector.broadcast %26 : vector<8x1xf32> to vector<8x32xf32>
    %28 = arith.mulf %18, %27 : vector<8x32xf32>
    %29 = vector.broadcast %12 : vector<1x32xf32> to vector<8x32xf32>
    %30 = arith.mulf %28, %29 : vector<8x32xf32>
    %31 = arith.truncf %30 : vector<8x32xf32> to vector<8x32xbf16>
    %c0_15 = arith.constant 0 : index
    %c0_16 = arith.constant 0 : index
    %c0_17 = arith.constant 0 : index
    %32 = vector.load %arg5[%c0_15, %c0_16, %c0_17] : memref<2x32x96xbf16, #tpu.memory_space<vmem>>, vector<1x32x96xbf16>
    %33 = vector.shape_cast %32 : vector<1x32x96xbf16> to vector<32x96xbf16>
    %cst_18 = arith.constant dense<0.000000e+00> : vector<8x96xf32>
    %34 = tpu.matmul %31, %33, %cst_18 {dimension_numbers = #tpu.dot_dimension_numbers<[1], [0], [0], [1], [0, 0, 1, 1], [], []>} : vector<8x32xbf16>, vector<32x96xbf16>, vector<8x96xf32> -> vector<8x96xf32>
    %35 = vector.extract_strided_slice %34 {offsets = [0, 0], sizes = [8, 8], strides = [1, 1]} : vector<8x96xf32> to vector<8x8xf32>
    %36 = vector.extract_strided_slice %34 {offsets = [0, 32], sizes = [8, 8], strides = [1, 1]} : vector<8x96xf32> to vector<8x8xf32>
    %37 = vector.extract_strided_slice %34 {offsets = [0, 64], sizes = [8, 8], strides = [1, 1]} : vector<8x96xf32> to vector<8x8xf32>
    %38 = vector.extract_strided_slice %35 {offsets = [0, 0], sizes = [8, 4], strides = [1, 1]} : vector<8x8xf32> to vector<8x4xf32>
    %39 = vector.extract_strided_slice %35 {offsets = [0, 4], sizes = [8, 4], strides = [1, 1]} : vector<8x8xf32> to vector<8x4xf32>
    %40 = vector.extract_strided_slice %36 {offsets = [0, 0], sizes = [8, 4], strides = [1, 1]} : vector<8x8xf32> to vector<8x4xf32>
    %41 = vector.extract_strided_slice %36 {offsets = [0, 4], sizes = [8, 4], strides = [1, 1]} : vector<8x8xf32> to vector<8x4xf32>
    %42 = arith.mulf %38, %5 : vector<8x4xf32>
    %43 = arith.mulf %39, %7 : vector<8x4xf32>
    %44 = arith.subf %42, %43 : vector<8x4xf32>
    %45 = arith.mulf %38, %7 : vector<8x4xf32>
    %46 = arith.mulf %39, %5 : vector<8x4xf32>
    %47 = arith.addf %45, %46 : vector<8x4xf32>
    %48 = tpu.concatenate %44, %47 in 1 : vector<8x4xf32>, vector<8x4xf32> -> vector<8x8xf32>
    %49 = arith.mulf %40, %2 : vector<8x4xf32>
    %50 = arith.mulf %41, %3 : vector<8x4xf32>
    %51 = arith.subf %49, %50 : vector<8x4xf32>
    %52 = arith.mulf %40, %3 : vector<8x4xf32>
    %53 = arith.mulf %41, %2 : vector<8x4xf32>
    %54 = arith.addf %52, %53 : vector<8x4xf32>
    %55 = tpu.concatenate %51, %54 in 1 : vector<8x4xf32>, vector<8x4xf32> -> vector<8x8xf32>
    %56 = arith.truncf %48 : vector<8x8xf32> to vector<8x8xbf16>
    %57 = arith.truncf %55 : vector<8x8xf32> to vector<8x8xbf16>
    %cst_19 = arith.constant dense<0.000000e+00> : vector<8x8xf32>
    %58 = tpu.matmul %56, %57, %cst_19 {dimension_numbers = #tpu.dot_dimension_numbers<[1], [1], [0], [0], [0, 0, 1, 0], [], []>} : vector<8x8xbf16>, vector<8x8xbf16>, vector<8x8xf32> -> vector<8x8xf32>
    %cst_20 = arith.constant -1.000000e+30 : f32
    %59 = vector.broadcast %cst_20 : f32 to vector<8x8xf32>
    %60 = arith.select %10, %58, %59 : vector<8x8xi1>, vector<8x8xf32>
    %cst_21 = arith.constant dense<0xFF800000> : vector<8xf32>
    %61 = vector.multi_reduction <maximumf>, %60, %cst_21 [1] : vector<8x8xf32> to vector<8xf32>
    %62 = vector.shape_cast %61 : vector<8xf32> to vector<8x1xf32>
    %63 = vector.broadcast %62 : vector<8x1xf32> to vector<8x8xf32>
    %64 = arith.subf %60, %63 : vector<8x8xf32>
    %65 = math.exp %64 : vector<8x8xf32>
    %cst_22 = arith.constant dense<0.000000e+00> : vector<8xf32>
    %66 = vector.multi_reduction <add>, %65, %cst_22 [1] : vector<8x8xf32> to vector<8xf32>
    %67 = vector.shape_cast %66 : vector<8xf32> to vector<8x1xf32>
    %68 = tpu.reciprocal %67 {approx = true} : vector<8x1xf32> -> vector<8x1xf32>
    %69 = vector.broadcast %68 : vector<8x1xf32> to vector<8x8xf32>
    %70 = arith.mulf %65, %69 : vector<8x8xf32>
    %71 = arith.truncf %70 : vector<8x8xf32> to vector<8x8xbf16>
    %72 = arith.truncf %37 : vector<8x8xf32> to vector<8x8xbf16>
    %cst_23 = arith.constant dense<0.000000e+00> : vector<8x8xf32>
    %73 = tpu.matmul %71, %72, %cst_23 {dimension_numbers = #tpu.dot_dimension_numbers<[1], [0], [0], [1], [0, 0, 1, 1], [], []>} : vector<8x8xbf16>, vector<8x8xbf16>, vector<8x8xf32> -> vector<8x8xf32>
    %c0_24 = arith.constant 0 : index
    %c0_25 = arith.constant 0 : index
    %74 = vector.load %arg13[%c0_24, %c0_25] : memref<8x32xf32, #tpu.memory_space<vmem>>, vector<8x8xf32>
    tpu.vector_store %arg13[%c0_24, %c0_25], %73 {strides = array<i32>} : memref<8x32xf32, #tpu.memory_space<vmem>>, vector<8x8xf32>,
    %75 = vector.extract_strided_slice %34 {offsets = [0, 8], sizes = [8, 8], strides = [1, 1]} : vector<8x96xf32> to vector<8x8xf32>
    %76 = vector.extract_strided_slice %34 {offsets = [0, 40], sizes = [8, 8], strides = [1, 1]} : vector<8x96xf32> to vector<8x8xf32>
    %77 = vector.extract_strided_slice %34 {offsets = [0, 72], sizes = [8, 8], strides = [1, 1]} : vector<8x96xf32> to vector<8x8xf32>
    %78 = vector.extract_strided_slice %75 {offsets = [0, 0], sizes = [8, 4], strides = [1, 1]} : vector<8x8xf32> to vector<8x4xf32>
    %79 = vector.extract_strided_slice %75 {offsets = [0, 4], sizes = [8, 4], strides = [1, 1]} : vector<8x8xf32> to vector<8x4xf32>
    %80 = vector.extract_strided_slice %76 {offsets = [0, 0], sizes = [8, 4], strides = [1, 1]} : vector<8x8xf32> to vector<8x4xf32>
    %81 = vector.extract_strided_slice %76 {offsets = [0, 4], sizes = [8, 4], strides = [1, 1]} : vector<8x8xf32> to vector<8x4xf32>
    %82 = arith.mulf %78, %5 : vector<8x4xf32>
    %83 = arith.mulf %79, %7 : vector<8x4xf32>
    %84 = arith.subf %82, %83 : vector<8x4xf32>
    %85 = arith.mulf %78, %7 : vector<8x4xf32>
    %86 = arith.mulf %79, %5 : vector<8x4xf32>
    %87 = arith.addf %85, %86 : vector<8x4xf32>
    %88 = tpu.concatenate %84, %87 in 1 : vector<8x4xf32>, vector<8x4xf32> -> vector<8x8xf32>
    %89 = arith.mulf %80, %2 : vector<8x4xf32>
    %90 = arith.mulf %81, %3 : vector<8x4xf32>
    %91 = arith.subf %89, %90 : vector<8x4xf32>
    %92 = arith.mulf %80, %3 : vector<8x4xf32>
    %93 = arith.mulf %81, %2 : vector<8x4xf32>
    %94 = arith.addf %92, %93 : vector<8x4xf32>
    %95 = tpu.concatenate %91, %94 in 1 : vector<8x4xf32>, vector<8x4xf32> -> vector<8x8xf32>
    %96 = arith.truncf %88 : vector<8x8xf32> to vector<8x8xbf16>
    %97 = arith.truncf %95 : vector<8x8xf32> to vector<8x8xbf16>
    %cst_26 = arith.constant dense<0.000000e+00> : vector<8x8xf32>
    %98 = tpu.matmul %96, %97, %cst_26 {dimension_numbers = #tpu.dot_dimension_numbers<[1], [1], [0], [0], [0, 0, 1, 0], [], []>} : vector<8x8xbf16>, vector<8x8xbf16>, vector<8x8xf32> -> vector<8x8xf32>
    %cst_27 = arith.constant -1.000000e+30 : f32
    %99 = vector.broadcast %cst_27 : f32 to vector<8x8xf32>
    %100 = arith.select %10, %98, %99 : vector<8x8xi1>, vector<8x8xf32>
    %cst_28 = arith.constant dense<0xFF800000> : vector<8xf32>
    %101 = vector.multi_reduction <maximumf>, %100, %cst_28 [1] : vector<8x8xf32> to vector<8xf32>
    %102 = vector.shape_cast %101 : vector<8xf32> to vector<8x1xf32>
    %103 = vector.broadcast %102 : vector<8x1xf32> to vector<8x8xf32>
    %104 = arith.subf %100, %103 : vector<8x8xf32>
    %105 = math.exp %104 : vector<8x8xf32>
    %cst_29 = arith.constant dense<0.000000e+00> : vector<8xf32>
    %106 = vector.multi_reduction <add>, %105, %cst_29 [1] : vector<8x8xf32> to vector<8xf32>
    %107 = vector.shape_cast %106 : vector<8xf32> to vector<8x1xf32>
    %108 = tpu.reciprocal %107 {approx = true} : vector<8x1xf32> -> vector<8x1xf32>
    %109 = vector.broadcast %108 : vector<8x1xf32> to vector<8x8xf32>
    %110 = arith.mulf %105, %109 : vector<8x8xf32>
    %111 = arith.truncf %110 : vector<8x8xf32> to vector<8x8xbf16>
    %112 = arith.truncf %77 : vector<8x8xf32> to vector<8x8xbf16>
    %cst_30 = arith.constant dense<0.000000e+00> : vector<8x8xf32>
    %113 = tpu.matmul %111, %112, %cst_30 {dimension_numbers = #tpu.dot_dimension_numbers<[1], [0], [0], [1], [0, 0, 1, 1], [], []>} : vector<8x8xbf16>, vector<8x8xbf16>, vector<8x8xf32> -> vector<8x8xf32>
    %c0_31 = arith.constant 0 : index
    %c8 = arith.constant 8 : index
    %114 = vector.load %arg13[%c0_31, %c8] : memref<8x32xf32, #tpu.memory_space<vmem>>, vector<8x8xf32>
    tpu.vector_store %arg13[%c0_31, %c8], %113 {strides = array<i32>} : memref<8x32xf32, #tpu.memory_space<vmem>>, vector<8x8xf32>,
    %115 = vector.extract_strided_slice %34 {offsets = [0, 16], sizes = [8, 8], strides = [1, 1]} : vector<8x96xf32> to vector<8x8xf32>
    %116 = vector.extract_strided_slice %34 {offsets = [0, 48], sizes = [8, 8], strides = [1, 1]} : vector<8x96xf32> to vector<8x8xf32>
    %117 = vector.extract_strided_slice %34 {offsets = [0, 80], sizes = [8, 8], strides = [1, 1]} : vector<8x96xf32> to vector<8x8xf32>
    %118 = vector.extract_strided_slice %115 {offsets = [0, 0], sizes = [8, 4], strides = [1, 1]} : vector<8x8xf32> to vector<8x4xf32>
    %119 = vector.extract_strided_slice %115 {offsets = [0, 4], sizes = [8, 4], strides = [1, 1]} : vector<8x8xf32> to vector<8x4xf32>
    %120 = vector.extract_strided_slice %116 {offsets = [0, 0], sizes = [8, 4], strides = [1, 1]} : vector<8x8xf32> to vector<8x4xf32>
    %121 = vector.extract_strided_slice %116 {offsets = [0, 4], sizes = [8, 4], strides = [1, 1]} : vector<8x8xf32> to vector<8x4xf32>
    %122 = arith.mulf %118, %5 : vector<8x4xf32>
    %123 = arith.mulf %119, %7 : vector<8x4xf32>
    %124 = arith.subf %122, %123 : vector<8x4xf32>
    %125 = arith.mulf %118, %7 : vector<8x4xf32>
    %126 = arith.mulf %119, %5 : vector<8x4xf32>
    %127 = arith.addf %125, %126 : vector<8x4xf32>
    %128 = tpu.concatenate %124, %127 in 1 : vector<8x4xf32>, vector<8x4xf32> -> vector<8x8xf32>
    %129 = arith.mulf %120, %2 : vector<8x4xf32>
    %130 = arith.mulf %121, %3 : vector<8x4xf32>
    %131 = arith.subf %129, %130 : vector<8x4xf32>
    %132 = arith.mulf %120, %3 : vector<8x4xf32>
    %133 = arith.mulf %121, %2 : vector<8x4xf32>
    %134 = arith.addf %132, %133 : vector<8x4xf32>
    %135 = tpu.concatenate %131, %134 in 1 : vector<8x4xf32>, vector<8x4xf32> -> vector<8x8xf32>
    %136 = arith.truncf %128 : vector<8x8xf32> to vector<8x8xbf16>
    %137 = arith.truncf %135 : vector<8x8xf32> to vector<8x8xbf16>
    %cst_32 = arith.constant dense<0.000000e+00> : vector<8x8xf32>
    %138 = tpu.matmul %136, %137, %cst_32 {dimension_numbers = #tpu.dot_dimension_numbers<[1], [1], [0], [0], [0, 0, 1, 0], [], []>} : vector<8x8xbf16>, vector<8x8xbf16>, vector<8x8xf32> -> vector<8x8xf32>
    %cst_33 = arith.constant -1.000000e+30 : f32
    %139 = vector.broadcast %cst_33 : f32 to vector<8x8xf32>
    %140 = arith.select %10, %138, %139 : vector<8x8xi1>, vector<8x8xf32>
    %cst_34 = arith.constant dense<0xFF800000> : vector<8xf32>
    %141 = vector.multi_reduction <maximumf>, %140, %cst_34 [1] : vector<8x8xf32> to vector<8xf32>
    %142 = vector.shape_cast %141 : vector<8xf32> to vector<8x1xf32>
    %143 = vector.broadcast %142 : vector<8x1xf32> to vector<8x8xf32>
    %144 = arith.subf %140, %143 : vector<8x8xf32>
    %145 = math.exp %144 : vector<8x8xf32>
    %cst_35 = arith.constant dense<0.000000e+00> : vector<8xf32>
    %146 = vector.multi_reduction <add>, %145, %cst_35 [1] : vector<8x8xf32> to vector<8xf32>
    %147 = vector.shape_cast %146 : vector<8xf32> to vector<8x1xf32>
    %148 = tpu.reciprocal %147 {approx = true} : vector<8x1xf32> -> vector<8x1xf32>
    %149 = vector.broadcast %148 : vector<8x1xf32> to vector<8x8xf32>
    %150 = arith.mulf %145, %149 : vector<8x8xf32>
    %151 = arith.truncf %150 : vector<8x8xf32> to vector<8x8xbf16>
    %152 = arith.truncf %117 : vector<8x8xf32> to vector<8x8xbf16>
    %cst_36 = arith.constant dense<0.000000e+00> : vector<8x8xf32>
    %153 = tpu.matmul %151, %152, %cst_36 {dimension_numbers = #tpu.dot_dimension_numbers<[1], [0], [0], [1], [0, 0, 1, 1], [], []>} : vector<8x8xbf16>, vector<8x8xbf16>, vector<8x8xf32> -> vector<8x8xf32>
    %c0_37 = arith.constant 0 : index
    %c16 = arith.constant 16 : index
    %154 = vector.load %arg13[%c0_37, %c16] : memref<8x32xf32, #tpu.memory_space<vmem>>, vector<8x8xf32>
    tpu.vector_store %arg13[%c0_37, %c16], %153 {strides = array<i32>} : memref<8x32xf32, #tpu.memory_space<vmem>>, vector<8x8xf32>,
    %155 = vector.extract_strided_slice %34 {offsets = [0, 24], sizes = [8, 8], strides = [1, 1]} : vector<8x96xf32> to vector<8x8xf32>
    %156 = vector.extract_strided_slice %34 {offsets = [0, 56], sizes = [8, 8], strides = [1, 1]} : vector<8x96xf32> to vector<8x8xf32>
    %157 = vector.extract_strided_slice %34 {offsets = [0, 88], sizes = [8, 8], strides = [1, 1]} : vector<8x96xf32> to vector<8x8xf32>
    %158 = vector.extract_strided_slice %155 {offsets = [0, 0], sizes = [8, 4], strides = [1, 1]} : vector<8x8xf32> to vector<8x4xf32>
    %159 = vector.extract_strided_slice %155 {offsets = [0, 4], sizes = [8, 4], strides = [1, 1]} : vector<8x8xf32> to vector<8x4xf32>
    %160 = vector.extract_strided_slice %156 {offsets = [0, 0], sizes = [8, 4], strides = [1, 1]} : vector<8x8xf32> to vector<8x4xf32>
    %161 = vector.extract_strided_slice %156 {offsets = [0, 4], sizes = [8, 4], strides = [1, 1]} : vector<8x8xf32> to vector<8x4xf32>
    %162 = arith.mulf %158, %5 : vector<8x4xf32>
    %163 = arith.mulf %159, %7 : vector<8x4xf32>
    %164 = arith.subf %162, %163 : vector<8x4xf32>
    %165 = arith.mulf %158, %7 : vector<8x4xf32>
    %166 = arith.mulf %159, %5 : vector<8x4xf32>
    %167 = arith.addf %165, %166 : vector<8x4xf32>
    %168 = tpu.concatenate %164, %167 in 1 : vector<8x4xf32>, vector<8x4xf32> -> vector<8x8xf32>
    %169 = arith.mulf %160, %2 : vector<8x4xf32>
    %170 = arith.mulf %161, %3 : vector<8x4xf32>
    %171 = arith.subf %169, %170 : vector<8x4xf32>
    %172 = arith.mulf %160, %3 : vector<8x4xf32>
    %173 = arith.mulf %161, %2 : vector<8x4xf32>
    %174 = arith.addf %172, %173 : vector<8x4xf32>
    %175 = tpu.concatenate %171, %174 in 1 : vector<8x4xf32>, vector<8x4xf32> -> vector<8x8xf32>
    %176 = arith.truncf %168 : vector<8x8xf32> to vector<8x8xbf16>
    %177 = arith.truncf %175 : vector<8x8xf32> to vector<8x8xbf16>
    %cst_38 = arith.constant dense<0.000000e+00> : vector<8x8xf32>
    %178 = tpu.matmul %176, %177, %cst_38 {dimension_numbers = #tpu.dot_dimension_numbers<[1], [1], [0], [0], [0, 0, 1, 0], [], []>} : vector<8x8xbf16>, vector<8x8xbf16>, vector<8x8xf32> -> vector<8x8xf32>
    %cst_39 = arith.constant -1.000000e+30 : f32
    %179 = vector.broadcast %cst_39 : f32 to vector<8x8xf32>
    %180 = arith.select %10, %178, %179 : vector<8x8xi1>, vector<8x8xf32>
    %cst_40 = arith.constant dense<0xFF800000> : vector<8xf32>
    %181 = vector.multi_reduction <maximumf>, %180, %cst_40 [1] : vector<8x8xf32> to vector<8xf32>
    %182 = vector.shape_cast %181 : vector<8xf32> to vector<8x1xf32>
    %183 = vector.broadcast %182 : vector<8x1xf32> to vector<8x8xf32>
    %184 = arith.subf %180, %183 : vector<8x8xf32>
    %185 = math.exp %184 : vector<8x8xf32>
    %cst_41 = arith.constant dense<0.000000e+00> : vector<8xf32>
    %186 = vector.multi_reduction <add>, %185, %cst_41 [1] : vector<8x8xf32> to vector<8xf32>
    %187 = vector.shape_cast %186 : vector<8xf32> to vector<8x1xf32>
    %188 = tpu.reciprocal %187 {approx = true} : vector<8x1xf32> -> vector<8x1xf32>
    %189 = vector.broadcast %188 : vector<8x1xf32> to vector<8x8xf32>
    %190 = arith.mulf %185, %189 : vector<8x8xf32>
    %191 = arith.truncf %190 : vector<8x8xf32> to vector<8x8xbf16>
    %192 = arith.truncf %157 : vector<8x8xf32> to vector<8x8xbf16>
    %cst_42 = arith.constant dense<0.000000e+00> : vector<8x8xf32>
    %193 = tpu.matmul %191, %192, %cst_42 {dimension_numbers = #tpu.dot_dimension_numbers<[1], [0], [0], [1], [0, 0, 1, 1], [], []>} : vector<8x8xbf16>, vector<8x8xbf16>, vector<8x8xf32> -> vector<8x8xf32>
    %c0_43 = arith.constant 0 : index
    %c24 = arith.constant 24 : index
    %194 = vector.load %arg13[%c0_43, %c24] : memref<8x32xf32, #tpu.memory_space<vmem>>, vector<8x8xf32>
    tpu.vector_store %arg13[%c0_43, %c24], %193 {strides = array<i32>} : memref<8x32xf32, #tpu.memory_space<vmem>>, vector<8x8xf32>,
    %c0_44 = arith.constant 0 : index
    %c0_45 = arith.constant 0 : index
    %195 = vector.load %arg13[%c0_44, %c0_45] : memref<8x32xf32, #tpu.memory_space<vmem>>, vector<8x32xf32>
    %196 = arith.truncf %195 : vector<8x32xf32> to vector<8x32xbf16>
    %c0_46 = arith.constant 0 : index
    %c0_47 = arith.constant 0 : index
    %c0_48 = arith.constant 0 : index
    %197 = vector.load %arg6[%c0_46, %c0_47, %c0_48] : memref<2x32x32xbf16, #tpu.memory_space<vmem>>, vector<1x32x32xbf16>
    %198 = vector.shape_cast %197 : vector<1x32x32xbf16> to vector<32x32xbf16>
    %cst_49 = arith.constant dense<0.000000e+00> : vector<8x32xf32>
    %199 = tpu.matmul %196, %198, %cst_49 {dimension_numbers = #tpu.dot_dimension_numbers<[1], [0], [0], [1], [0, 0, 1, 1], [], []>} : vector<8x32xbf16>, vector<32x32xbf16>, vector<8x32xf32> -> vector<8x32xf32>
    %200 = arith.addf %1, %199 : vector<8x32xf32>
    %c0_50 = arith.constant 0 : index
    %c0_51 = arith.constant 0 : index
    %c0_52 = arith.constant 0 : index
    %201 = vector.load %arg7[%c0_50, %c0_51, %c0_52] : memref<2x1x32xf32, #tpu.memory_space<vmem>>, vector<1x1x32xf32>
    %202 = vector.shape_cast %201 : vector<1x1x32xf32> to vector<1x32xf32>
    %cst_53 = arith.constant dense<0.000000e+00> : vector<8xf32>
    %203 = vector.multi_reduction <add>, %200, %cst_53 [1] : vector<8x32xf32> to vector<8xf32>
    %204 = vector.shape_cast %203 : vector<8xf32> to vector<8x1xf32>
    %cst_54 = arith.constant 3.200000e+01 : f32
    %205 = vector.broadcast %cst_54 : f32 to vector<8x1xf32>
    %206 = arith.divf %204, %205 : vector<8x1xf32>
    %207 = vector.broadcast %206 : vector<8x1xf32> to vector<8x32xf32>
    %208 = arith.subf %200, %207 : vector<8x32xf32>
    %209 = arith.mulf %208, %208 : vector<8x32xf32>
    %cst_55 = arith.constant dense<0.000000e+00> : vector<8xf32>
    %210 = vector.multi_reduction <add>, %209, %cst_55 [1] : vector<8x32xf32> to vector<8xf32>
    %211 = vector.shape_cast %210 : vector<8xf32> to vector<8x1xf32>
    %cst_56 = arith.constant 3.200000e+01 : f32
    %212 = vector.broadcast %cst_56 : f32 to vector<8x1xf32>
    %213 = arith.divf %211, %212 : vector<8x1xf32>
    %cst_57 = arith.constant 9.99999974E-6 : f32
    %214 = vector.broadcast %cst_57 : f32 to vector<8x1xf32>
    %215 = arith.addf %213, %214 : vector<8x1xf32>
    %216 = math.rsqrt %215 : vector<8x1xf32>
    %217 = vector.broadcast %216 : vector<8x1xf32> to vector<8x32xf32>
    %218 = arith.mulf %208, %217 : vector<8x32xf32>
    %219 = vector.broadcast %202 : vector<1x32xf32> to vector<8x32xf32>
    %220 = arith.mulf %218, %219 : vector<8x32xf32>
    %221 = arith.truncf %220 : vector<8x32xf32> to vector<8x32xbf16>
    %c0_58 = arith.constant 0 : index
    %c0_59 = arith.constant 0 : index
    %c0_60 = arith.constant 0 : index
    %222 = vector.load %arg8[%c0_58, %c0_59, %c0_60] : memref<2x32x128xbf16, #tpu.memory_space<vmem>>, vector<1x32x128xbf16>
    %223 = vector.shape_cast %222 : vector<1x32x128xbf16> to vector<32x128xbf16>
    %cst_61 = arith.constant dense<0.000000e+00> : vector<8x128xf32>
    %224 = tpu.matmul %221, %223, %cst_61 {dimension_numbers = #tpu.dot_dimension_numbers<[1], [0], [0], [1], [0, 0, 1, 1], [], []>} : vector<8x32xbf16>, vector<32x128xbf16>, vector<8x128xf32> -> vector<8x128xf32>
    %cst_62 = arith.constant 5.000000e-01 : f32
    %225 = vector.broadcast %cst_62 : f32 to vector<8x128xf32>
    %226 = arith.mulf %225, %224 : vector<8x128xf32>
    %cst_63 = arith.constant 4.471500e-02 : f32
    %227 = vector.broadcast %cst_63 : f32 to vector<8x128xf32>
    %228 = arith.mulf %227, %224 : vector<8x128xf32>
    %229 = arith.mulf %228, %224 : vector<8x128xf32>
    %230 = arith.mulf %229, %224 : vector<8x128xf32>
    %231 = arith.addf %224, %230 : vector<8x128xf32>
    %cst_64 = arith.constant 0.797884583 : f32
    %232 = vector.broadcast %cst_64 : f32 to vector<8x128xf32>
    %233 = arith.mulf %232, %231 : vector<8x128xf32>
    %234 = math.tanh %233 : vector<8x128xf32>
    %cst_65 = arith.constant 1.000000e+00 : f32
    %235 = vector.broadcast %cst_65 : f32 to vector<8x128xf32>
    %236 = arith.addf %235, %234 : vector<8x128xf32>
    %237 = arith.mulf %226, %236 : vector<8x128xf32>
    %238 = arith.truncf %237 : vector<8x128xf32> to vector<8x128xbf16>
    %c0_66 = arith.constant 0 : index
    %c0_67 = arith.constant 0 : index
    %c0_68 = arith.constant 0 : index
    %239 = vector.load %arg9[%c0_66, %c0_67, %c0_68] : memref<2x128x32xbf16, #tpu.memory_space<vmem>>, vector<1x128x32xbf16>
    %240 = vector.shape_cast %239 : vector<1x128x32xbf16> to vector<128x32xbf16>
    %cst_69 = arith.constant dense<0.000000e+00> : vector<8x32xf32>
    %241 = tpu.matmul %238, %240, %cst_69 {dimension_numbers = #tpu.dot_dimension_numbers<[1], [0], [0], [1], [0, 0, 1, 1], [], []>} : vector<8x128xbf16>, vector<128x32xbf16>, vector<8x32xf32> -> vector<8x32xf32>
    %242 = arith.addf %200, %241 : vector<8x32xf32>
    %c1 = arith.constant 1 : index
    %c0_70 = arith.constant 0 : index
    %c0_71 = arith.constant 0 : index
    %243 = vector.load %arg4[%c1, %c0_70, %c0_71] : memref<2x1x32xf32, #tpu.memory_space<vmem>>, vector<1x1x32xf32>
    %244 = vector.shape_cast %243 : vector<1x1x32xf32> to vector<1x32xf32>
    %cst_72 = arith.constant dense<0.000000e+00> : vector<8xf32>
    %245 = vector.multi_reduction <add>, %242, %cst_72 [1] : vector<8x32xf32> to vector<8xf32>
    %246 = vector.shape_cast %245 : vector<8xf32> to vector<8x1xf32>
    %cst_73 = arith.constant 3.200000e+01 : f32
    %247 = vector.broadcast %cst_73 : f32 to vector<8x1xf32>
    %248 = arith.divf %246, %247 : vector<8x1xf32>
    %249 = vector.broadcast %248 : vector<8x1xf32> to vector<8x32xf32>
    %250 = arith.subf %242, %249 : vector<8x32xf32>
    %251 = arith.mulf %250, %250 : vector<8x32xf32>
    %cst_74 = arith.constant dense<0.000000e+00> : vector<8xf32>
    %252 = vector.multi_reduction <add>, %251, %cst_74 [1] : vector<8x32xf32> to vector<8xf32>
    %253 = vector.shape_cast %252 : vector<8xf32> to vector<8x1xf32>
    %cst_75 = arith.constant 3.200000e+01 : f32
    %254 = vector.broadcast %cst_75 : f32 to vector<8x1xf32>
    %255 = arith.divf %253, %254 : vector<8x1xf32>
    %cst_76 = arith.constant 9.99999974E-6 : f32
    %256 = vector.broadcast %cst_76 : f32 to vector<8x1xf32>
    %257 = arith.addf %255, %256 : vector<8x1xf32>
    %258 = math.rsqrt %257 : vector<8x1xf32>
    %259 = vector.broadcast %258 : vector<8x1xf32> to vector<8x32xf32>
    %260 = arith.mulf %250, %259 : vector<8x32xf32>
    %261 = vector.broadcast %244 : vector<1x32xf32> to vector<8x32xf32>
    %262 = arith.mulf %260, %261 : vector<8x32xf32>
    %263 = arith.truncf %262 : vector<8x32xf32> to vector<8x32xbf16>
    %c1_77 = arith.constant 1 : index
    %c0_78 = arith.constant 0 : index
    %c0_79 = arith.constant 0 : index
    %264 = vector.load %arg5[%c1_77, %c0_78, %c0_79] : memref<2x32x96xbf16, #tpu.memory_space<vmem>>, vector<1x32x96xbf16>
    %265 = vector.shape_cast %264 : vector<1x32x96xbf16> to vector<32x96xbf16>
    %cst_80 = arith.constant dense<0.000000e+00> : vector<8x96xf32>
    %266 = tpu.matmul %263, %265, %cst_80 {dimension_numbers = #tpu.dot_dimension_numbers<[1], [0], [0], [1], [0, 0, 1, 1], [], []>} : vector<8x32xbf16>, vector<32x96xbf16>, vector<8x96xf32> -> vector<8x96xf32>
    %267 = vector.extract_strided_slice %266 {offsets = [0, 0], sizes = [8, 8], strides = [1, 1]} : vector<8x96xf32> to vector<8x8xf32>
    %268 = vector.extract_strided_slice %266 {offsets = [0, 32], sizes = [8, 8], strides = [1, 1]} : vector<8x96xf32> to vector<8x8xf32>
    %269 = vector.extract_strided_slice %266 {offsets = [0, 64], sizes = [8, 8], strides = [1, 1]} : vector<8x96xf32> to vector<8x8xf32>
    %270 = vector.extract_strided_slice %267 {offsets = [0, 0], sizes = [8, 4], strides = [1, 1]} : vector<8x8xf32> to vector<8x4xf32>
    %271 = vector.extract_strided_slice %267 {offsets = [0, 4], sizes = [8, 4], strides = [1, 1]} : vector<8x8xf32> to vector<8x4xf32>
    %272 = vector.extract_strided_slice %268 {offsets = [0, 0], sizes = [8, 4], strides = [1, 1]} : vector<8x8xf32> to vector<8x4xf32>
    %273 = vector.extract_strided_slice %268 {offsets = [0, 4], sizes = [8, 4], strides = [1, 1]} : vector<8x8xf32> to vector<8x4xf32>
    %274 = arith.mulf %270, %5 : vector<8x4xf32>
    %275 = arith.mulf %271, %7 : vector<8x4xf32>
    %276 = arith.subf %274, %275 : vector<8x4xf32>
    %277 = arith.mulf %270, %7 : vector<8x4xf32>
    %278 = arith.mulf %271, %5 : vector<8x4xf32>
    %279 = arith.addf %277, %278 : vector<8x4xf32>
    %280 = tpu.concatenate %276, %279 in 1 : vector<8x4xf32>, vector<8x4xf32> -> vector<8x8xf32>
    %281 = arith.mulf %272, %2 : vector<8x4xf32>
    %282 = arith.mulf %273, %3 : vector<8x4xf32>
    %283 = arith.subf %281, %282 : vector<8x4xf32>
    %284 = arith.mulf %272, %3 : vector<8x4xf32>
    %285 = arith.mulf %273, %2 : vector<8x4xf32>
    %286 = arith.addf %284, %285 : vector<8x4xf32>
    %287 = tpu.concatenate %283, %286 in 1 : vector<8x4xf32>, vector<8x4xf32> -> vector<8x8xf32>
    %288 = arith.truncf %280 : vector<8x8xf32> to vector<8x8xbf16>
    %289 = arith.truncf %287 : vector<8x8xf32> to vector<8x8xbf16>
    %cst_81 = arith.constant dense<0.000000e+00> : vector<8x8xf32>
    %290 = tpu.matmul %288, %289, %cst_81 {dimension_numbers = #tpu.dot_dimension_numbers<[1], [1], [0], [0], [0, 0, 1, 0], [], []>} : vector<8x8xbf16>, vector<8x8xbf16>, vector<8x8xf32> -> vector<8x8xf32>
    %cst_82 = arith.constant -1.000000e+30 : f32
    %291 = vector.broadcast %cst_82 : f32 to vector<8x8xf32>
    %292 = arith.select %10, %290, %291 : vector<8x8xi1>, vector<8x8xf32>
    %cst_83 = arith.constant dense<0xFF800000> : vector<8xf32>
    %293 = vector.multi_reduction <maximumf>, %292, %cst_83 [1] : vector<8x8xf32> to vector<8xf32>
    %294 = vector.shape_cast %293 : vector<8xf32> to vector<8x1xf32>
    %295 = vector.broadcast %294 : vector<8x1xf32> to vector<8x8xf32>
    %296 = arith.subf %292, %295 : vector<8x8xf32>
    %297 = math.exp %296 : vector<8x8xf32>
    %cst_84 = arith.constant dense<0.000000e+00> : vector<8xf32>
    %298 = vector.multi_reduction <add>, %297, %cst_84 [1] : vector<8x8xf32> to vector<8xf32>
    %299 = vector.shape_cast %298 : vector<8xf32> to vector<8x1xf32>
    %300 = tpu.reciprocal %299 {approx = true} : vector<8x1xf32> -> vector<8x1xf32>
    %301 = vector.broadcast %300 : vector<8x1xf32> to vector<8x8xf32>
    %302 = arith.mulf %297, %301 : vector<8x8xf32>
    %303 = arith.truncf %302 : vector<8x8xf32> to vector<8x8xbf16>
    %304 = arith.truncf %269 : vector<8x8xf32> to vector<8x8xbf16>
    %cst_85 = arith.constant dense<0.000000e+00> : vector<8x8xf32>
    %305 = tpu.matmul %303, %304, %cst_85 {dimension_numbers = #tpu.dot_dimension_numbers<[1], [0], [0], [1], [0, 0, 1, 1], [], []>} : vector<8x8xbf16>, vector<8x8xbf16>, vector<8x8xf32> -> vector<8x8xf32>
    %c0_86 = arith.constant 0 : index
    %c0_87 = arith.constant 0 : index
    %306 = vector.load %arg13[%c0_86, %c0_87] : memref<8x32xf32, #tpu.memory_space<vmem>>, vector<8x8xf32>
    tpu.vector_store %arg13[%c0_86, %c0_87], %305 {strides = array<i32>} : memref<8x32xf32, #tpu.memory_space<vmem>>, vector<8x8xf32>,
    %307 = vector.extract_strided_slice %266 {offsets = [0, 8], sizes = [8, 8], strides = [1, 1]} : vector<8x96xf32> to vector<8x8xf32>
    %308 = vector.extract_strided_slice %266 {offsets = [0, 40], sizes = [8, 8], strides = [1, 1]} : vector<8x96xf32> to vector<8x8xf32>
    %309 = vector.extract_strided_slice %266 {offsets = [0, 72], sizes = [8, 8], strides = [1, 1]} : vector<8x96xf32> to vector<8x8xf32>
    %310 = vector.extract_strided_slice %307 {offsets = [0, 0], sizes = [8, 4], strides = [1, 1]} : vector<8x8xf32> to vector<8x4xf32>
    %311 = vector.extract_strided_slice %307 {offsets = [0, 4], sizes = [8, 4], strides = [1, 1]} : vector<8x8xf32> to vector<8x4xf32>
    %312 = vector.extract_strided_slice %308 {offsets = [0, 0], sizes = [8, 4], strides = [1, 1]} : vector<8x8xf32> to vector<8x4xf32>
    %313 = vector.extract_strided_slice %308 {offsets = [0, 4], sizes = [8, 4], strides = [1, 1]} : vector<8x8xf32> to vector<8x4xf32>
    %314 = arith.mulf %310, %5 : vector<8x4xf32>
    %315 = arith.mulf %311, %7 : vector<8x4xf32>
    %316 = arith.subf %314, %315 : vector<8x4xf32>
    %317 = arith.mulf %310, %7 : vector<8x4xf32>
    %318 = arith.mulf %311, %5 : vector<8x4xf32>
    %319 = arith.addf %317, %318 : vector<8x4xf32>
    %320 = tpu.concatenate %316, %319 in 1 : vector<8x4xf32>, vector<8x4xf32> -> vector<8x8xf32>
    %321 = arith.mulf %312, %2 : vector<8x4xf32>
    %322 = arith.mulf %313, %3 : vector<8x4xf32>
    %323 = arith.subf %321, %322 : vector<8x4xf32>
    %324 = arith.mulf %312, %3 : vector<8x4xf32>
    %325 = arith.mulf %313, %2 : vector<8x4xf32>
    %326 = arith.addf %324, %325 : vector<8x4xf32>
    %327 = tpu.concatenate %323, %326 in 1 : vector<8x4xf32>, vector<8x4xf32> -> vector<8x8xf32>
    %328 = arith.truncf %320 : vector<8x8xf32> to vector<8x8xbf16>
    %329 = arith.truncf %327 : vector<8x8xf32> to vector<8x8xbf16>
    %cst_88 = arith.constant dense<0.000000e+00> : vector<8x8xf32>
    %330 = tpu.matmul %328, %329, %cst_88 {dimension_numbers = #tpu.dot_dimension_numbers<[1], [1], [0], [0], [0, 0, 1, 0], [], []>} : vector<8x8xbf16>, vector<8x8xbf16>, vector<8x8xf32> -> vector<8x8xf32>
    %cst_89 = arith.constant -1.000000e+30 : f32
    %331 = vector.broadcast %cst_89 : f32 to vector<8x8xf32>
    %332 = arith.select %10, %330, %331 : vector<8x8xi1>, vector<8x8xf32>
    %cst_90 = arith.constant dense<0xFF800000> : vector<8xf32>
    %333 = vector.multi_reduction <maximumf>, %332, %cst_90 [1] : vector<8x8xf32> to vector<8xf32>
    %334 = vector.shape_cast %333 : vector<8xf32> to vector<8x1xf32>
    %335 = vector.broadcast %334 : vector<8x1xf32> to vector<8x8xf32>
    %336 = arith.subf %332, %335 : vector<8x8xf32>
    %337 = math.exp %336 : vector<8x8xf32>
    %cst_91 = arith.constant dense<0.000000e+00> : vector<8xf32>
    %338 = vector.multi_reduction <add>, %337, %cst_91 [1] : vector<8x8xf32> to vector<8xf32>
    %339 = vector.shape_cast %338 : vector<8xf32> to vector<8x1xf32>
    %340 = tpu.reciprocal %339 {approx = true} : vector<8x1xf32> -> vector<8x1xf32>
    %341 = vector.broadcast %340 : vector<8x1xf32> to vector<8x8xf32>
    %342 = arith.mulf %337, %341 : vector<8x8xf32>
    %343 = arith.truncf %342 : vector<8x8xf32> to vector<8x8xbf16>
    %344 = arith.truncf %309 : vector<8x8xf32> to vector<8x8xbf16>
    %cst_92 = arith.constant dense<0.000000e+00> : vector<8x8xf32>
    %345 = tpu.matmul %343, %344, %cst_92 {dimension_numbers = #tpu.dot_dimension_numbers<[1], [0], [0], [1], [0, 0, 1, 1], [], []>} : vector<8x8xbf16>, vector<8x8xbf16>, vector<8x8xf32> -> vector<8x8xf32>
    %c0_93 = arith.constant 0 : index
    %c8_94 = arith.constant 8 : index
    %346 = vector.load %arg13[%c0_93, %c8_94] : memref<8x32xf32, #tpu.memory_space<vmem>>, vector<8x8xf32>
    tpu.vector_store %arg13[%c0_93, %c8_94], %345 {strides = array<i32>} : memref<8x32xf32, #tpu.memory_space<vmem>>, vector<8x8xf32>,
    %347 = vector.extract_strided_slice %266 {offsets = [0, 16], sizes = [8, 8], strides = [1, 1]} : vector<8x96xf32> to vector<8x8xf32>
    %348 = vector.extract_strided_slice %266 {offsets = [0, 48], sizes = [8, 8], strides = [1, 1]} : vector<8x96xf32> to vector<8x8xf32>
    %349 = vector.extract_strided_slice %266 {offsets = [0, 80], sizes = [8, 8], strides = [1, 1]} : vector<8x96xf32> to vector<8x8xf32>
    %350 = vector.extract_strided_slice %347 {offsets = [0, 0], sizes = [8, 4], strides = [1, 1]} : vector<8x8xf32> to vector<8x4xf32>
    %351 = vector.extract_strided_slice %347 {offsets = [0, 4], sizes = [8, 4], strides = [1, 1]} : vector<8x8xf32> to vector<8x4xf32>
    %352 = vector.extract_strided_slice %348 {offsets = [0, 0], sizes = [8, 4], strides = [1, 1]} : vector<8x8xf32> to vector<8x4xf32>
    %353 = vector.extract_strided_slice %348 {offsets = [0, 4], sizes = [8, 4], strides = [1, 1]} : vector<8x8xf32> to vector<8x4xf32>
    %354 = arith.mulf %350, %5 : vector<8x4xf32>
    %355 = arith.mulf %351, %7 : vector<8x4xf32>
    %356 = arith.subf %354, %355 : vector<8x4xf32>
    %357 = arith.mulf %350, %7 : vector<8x4xf32>
    %358 = arith.mulf %351, %5 : vector<8x4xf32>
    %359 = arith.addf %357, %358 : vector<8x4xf32>
    %360 = tpu.concatenate %356, %359 in 1 : vector<8x4xf32>, vector<8x4xf32> -> vector<8x8xf32>
    %361 = arith.mulf %352, %2 : vector<8x4xf32>
    %362 = arith.mulf %353, %3 : vector<8x4xf32>
    %363 = arith.subf %361, %362 : vector<8x4xf32>
    %364 = arith.mulf %352, %3 : vector<8x4xf32>
    %365 = arith.mulf %353, %2 : vector<8x4xf32>
    %366 = arith.addf %364, %365 : vector<8x4xf32>
    %367 = tpu.concatenate %363, %366 in 1 : vector<8x4xf32>, vector<8x4xf32> -> vector<8x8xf32>
    %368 = arith.truncf %360 : vector<8x8xf32> to vector<8x8xbf16>
    %369 = arith.truncf %367 : vector<8x8xf32> to vector<8x8xbf16>
    %cst_95 = arith.constant dense<0.000000e+00> : vector<8x8xf32>
    %370 = tpu.matmul %368, %369, %cst_95 {dimension_numbers = #tpu.dot_dimension_numbers<[1], [1], [0], [0], [0, 0, 1, 0], [], []>} : vector<8x8xbf16>, vector<8x8xbf16>, vector<8x8xf32> -> vector<8x8xf32>
    %cst_96 = arith.constant -1.000000e+30 : f32
    %371 = vector.broadcast %cst_96 : f32 to vector<8x8xf32>
    %372 = arith.select %10, %370, %371 : vector<8x8xi1>, vector<8x8xf32>
    %cst_97 = arith.constant dense<0xFF800000> : vector<8xf32>
    %373 = vector.multi_reduction <maximumf>, %372, %cst_97 [1] : vector<8x8xf32> to vector<8xf32>
    %374 = vector.shape_cast %373 : vector<8xf32> to vector<8x1xf32>
    %375 = vector.broadcast %374 : vector<8x1xf32> to vector<8x8xf32>
    %376 = arith.subf %372, %375 : vector<8x8xf32>
    %377 = math.exp %376 : vector<8x8xf32>
    %cst_98 = arith.constant dense<0.000000e+00> : vector<8xf32>
    %378 = vector.multi_reduction <add>, %377, %cst_98 [1] : vector<8x8xf32> to vector<8xf32>
    %379 = vector.shape_cast %378 : vector<8xf32> to vector<8x1xf32>
    %380 = tpu.reciprocal %379 {approx = true} : vector<8x1xf32> -> vector<8x1xf32>
    %381 = vector.broadcast %380 : vector<8x1xf32> to vector<8x8xf32>
    %382 = arith.mulf %377, %381 : vector<8x8xf32>
    %383 = arith.truncf %382 : vector<8x8xf32> to vector<8x8xbf16>
    %384 = arith.truncf %349 : vector<8x8xf32> to vector<8x8xbf16>
    %cst_99 = arith.constant dense<0.000000e+00> : vector<8x8xf32>
    %385 = tpu.matmul %383, %384, %cst_99 {dimension_numbers = #tpu.dot_dimension_numbers<[1], [0], [0], [1], [0, 0, 1, 1], [], []>} : vector<8x8xbf16>, vector<8x8xbf16>, vector<8x8xf32> -> vector<8x8xf32>
    %c0_100 = arith.constant 0 : index
    %c16_101 = arith.constant 16 : index
    %386 = vector.load %arg13[%c0_100, %c16_101] : memref<8x32xf32, #tpu.memory_space<vmem>>, vector<8x8xf32>
    tpu.vector_store %arg13[%c0_100, %c16_101], %385 {strides = array<i32>} : memref<8x32xf32, #tpu.memory_space<vmem>>, vector<8x8xf32>,
    %387 = vector.extract_strided_slice %266 {offsets = [0, 24], sizes = [8, 8], strides = [1, 1]} : vector<8x96xf32> to vector<8x8xf32>
    %388 = vector.extract_strided_slice %266 {offsets = [0, 56], sizes = [8, 8], strides = [1, 1]} : vector<8x96xf32> to vector<8x8xf32>
    %389 = vector.extract_strided_slice %266 {offsets = [0, 88], sizes = [8, 8], strides = [1, 1]} : vector<8x96xf32> to vector<8x8xf32>
    %390 = vector.extract_strided_slice %387 {offsets = [0, 0], sizes = [8, 4], strides = [1, 1]} : vector<8x8xf32> to vector<8x4xf32>
    %391 = vector.extract_strided_slice %387 {offsets = [0, 4], sizes = [8, 4], strides = [1, 1]} : vector<8x8xf32> to vector<8x4xf32>
    %392 = vector.extract_strided_slice %388 {offsets = [0, 0], sizes = [8, 4], strides = [1, 1]} : vector<8x8xf32> to vector<8x4xf32>
    %393 = vector.extract_strided_slice %388 {offsets = [0, 4], sizes = [8, 4], strides = [1, 1]} : vector<8x8xf32> to vector<8x4xf32>
    %394 = arith.mulf %390, %5 : vector<8x4xf32>
    %395 = arith.mulf %391, %7 : vector<8x4xf32>
    %396 = arith.subf %394, %395 : vector<8x4xf32>
    %397 = arith.mulf %390, %7 : vector<8x4xf32>
    %398 = arith.mulf %391, %5 : vector<8x4xf32>
    %399 = arith.addf %397, %398 : vector<8x4xf32>
    %400 = tpu.concatenate %396, %399 in 1 : vector<8x4xf32>, vector<8x4xf32> -> vector<8x8xf32>
    %401 = arith.mulf %392, %2 : vector<8x4xf32>
    %402 = arith.mulf %393, %3 : vector<8x4xf32>
    %403 = arith.subf %401, %402 : vector<8x4xf32>
    %404 = arith.mulf %392, %3 : vector<8x4xf32>
    %405 = arith.mulf %393, %2 : vector<8x4xf32>
    %406 = arith.addf %404, %405 : vector<8x4xf32>
    %407 = tpu.concatenate %403, %406 in 1 : vector<8x4xf32>, vector<8x4xf32> -> vector<8x8xf32>
    %408 = arith.truncf %400 : vector<8x8xf32> to vector<8x8xbf16>
    %409 = arith.truncf %407 : vector<8x8xf32> to vector<8x8xbf16>
    %cst_102 = arith.constant dense<0.000000e+00> : vector<8x8xf32>
    %410 = tpu.matmul %408, %409, %cst_102 {dimension_numbers = #tpu.dot_dimension_numbers<[1], [1], [0], [0], [0, 0, 1, 0], [], []>} : vector<8x8xbf16>, vector<8x8xbf16>, vector<8x8xf32> -> vector<8x8xf32>
    %cst_103 = arith.constant -1.000000e+30 : f32
    %411 = vector.broadcast %cst_103 : f32 to vector<8x8xf32>
    %412 = arith.select %10, %410, %411 : vector<8x8xi1>, vector<8x8xf32>
    %cst_104 = arith.constant dense<0xFF800000> : vector<8xf32>
    %413 = vector.multi_reduction <maximumf>, %412, %cst_104 [1] : vector<8x8xf32> to vector<8xf32>
    %414 = vector.shape_cast %413 : vector<8xf32> to vector<8x1xf32>
    %415 = vector.broadcast %414 : vector<8x1xf32> to vector<8x8xf32>
    %416 = arith.subf %412, %415 : vector<8x8xf32>
    %417 = math.exp %416 : vector<8x8xf32>
    %cst_105 = arith.constant dense<0.000000e+00> : vector<8xf32>
    %418 = vector.multi_reduction <add>, %417, %cst_105 [1] : vector<8x8xf32> to vector<8xf32>
    %419 = vector.shape_cast %418 : vector<8xf32> to vector<8x1xf32>
    %420 = tpu.reciprocal %419 {approx = true} : vector<8x1xf32> -> vector<8x1xf32>
    %421 = vector.broadcast %420 : vector<8x1xf32> to vector<8x8xf32>
    %422 = arith.mulf %417, %421 : vector<8x8xf32>
    %423 = arith.truncf %422 : vector<8x8xf32> to vector<8x8xbf16>
    %424 = arith.truncf %389 : vector<8x8xf32> to vector<8x8xbf16>
    %cst_106 = arith.constant dense<0.000000e+00> : vector<8x8xf32>
    %425 = tpu.matmul %423, %424, %cst_106 {dimension_numbers = #tpu.dot_dimension_numbers<[1], [0], [0], [1], [0, 0, 1, 1], [], []>} : vector<8x8xbf16>, vector<8x8xbf16>, vector<8x8xf32> -> vector<8x8xf32>
    %c0_107 = arith.constant 0 : index
    %c24_108 = arith.constant 24 : index
    %426 = vector.load %arg13[%c0_107, %c24_108] : memref<8x32xf32, #tpu.memory_space<vmem>>, vector<8x8xf32>
    tpu.vector_store %arg13[%c0_107, %c24_108], %425 {strides = array<i32>} : memref<8x32xf32, #tpu.memory_space<vmem>>, vector<8x8xf32>,
    %c0_109 = arith.constant 0 : index
    %c0_110 = arith.constant 0 : index
    %427 = vector.load %arg13[%c0_109, %c0_110] : memref<8x32xf32, #tpu.memory_space<vmem>>, vector<8x32xf32>
    %428 = arith.truncf %427 : vector<8x32xf32> to vector<8x32xbf16>
    %c1_111 = arith.constant 1 : index
    %c0_112 = arith.constant 0 : index
    %c0_113 = arith.constant 0 : index
    %429 = vector.load %arg6[%c1_111, %c0_112, %c0_113] : memref<2x32x32xbf16, #tpu.memory_space<vmem>>, vector<1x32x32xbf16>
    %430 = vector.shape_cast %429 : vector<1x32x32xbf16> to vector<32x32xbf16>
    %cst_114 = arith.constant dense<0.000000e+00> : vector<8x32xf32>
    %431 = tpu.matmul %428, %430, %cst_114 {dimension_numbers = #tpu.dot_dimension_numbers<[1], [0], [0], [1], [0, 0, 1, 1], [], []>} : vector<8x32xbf16>, vector<32x32xbf16>, vector<8x32xf32> -> vector<8x32xf32>
    %432 = arith.addf %242, %431 : vector<8x32xf32>
    %c1_115 = arith.constant 1 : index
    %c0_116 = arith.constant 0 : index
    %c0_117 = arith.constant 0 : index
    %433 = vector.load %arg7[%c1_115, %c0_116, %c0_117] : memref<2x1x32xf32, #tpu.memory_space<vmem>>, vector<1x1x32xf32>
    %434 = vector.shape_cast %433 : vector<1x1x32xf32> to vector<1x32xf32>
    %cst_118 = arith.constant dense<0.000000e+00> : vector<8xf32>
    %435 = vector.multi_reduction <add>, %432, %cst_118 [1] : vector<8x32xf32> to vector<8xf32>
    %436 = vector.shape_cast %435 : vector<8xf32> to vector<8x1xf32>
    %cst_119 = arith.constant 3.200000e+01 : f32
    %437 = vector.broadcast %cst_119 : f32 to vector<8x1xf32>
    %438 = arith.divf %436, %437 : vector<8x1xf32>
    %439 = vector.broadcast %438 : vector<8x1xf32> to vector<8x32xf32>
    %440 = arith.subf %432, %439 : vector<8x32xf32>
    %441 = arith.mulf %440, %440 : vector<8x32xf32>
    %cst_120 = arith.constant dense<0.000000e+00> : vector<8xf32>
    %442 = vector.multi_reduction <add>, %441, %cst_120 [1] : vector<8x32xf32> to vector<8xf32>
    %443 = vector.shape_cast %442 : vector<8xf32> to vector<8x1xf32>
    %cst_121 = arith.constant 3.200000e+01 : f32
    %444 = vector.broadcast %cst_121 : f32 to vector<8x1xf32>
    %445 = arith.divf %443, %444 : vector<8x1xf32>
    %cst_122 = arith.constant 9.99999974E-6 : f32
    %446 = vector.broadcast %cst_122 : f32 to vector<8x1xf32>
    %447 = arith.addf %445, %446 : vector<8x1xf32>
    %448 = math.rsqrt %447 : vector<8x1xf32>
    %449 = vector.broadcast %448 : vector<8x1xf32> to vector<8x32xf32>
    %450 = arith.mulf %440, %449 : vector<8x32xf32>
    %451 = vector.broadcast %434 : vector<1x32xf32> to vector<8x32xf32>
    %452 = arith.mulf %450, %451 : vector<8x32xf32>
    %453 = arith.truncf %452 : vector<8x32xf32> to vector<8x32xbf16>
    %c1_123 = arith.constant 1 : index
    %c0_124 = arith.constant 0 : index
    %c0_125 = arith.constant 0 : index
    %454 = vector.load %arg8[%c1_123, %c0_124, %c0_125] : memref<2x32x128xbf16, #tpu.memory_space<vmem>>, vector<1x32x128xbf16>
    %455 = vector.shape_cast %454 : vector<1x32x128xbf16> to vector<32x128xbf16>
    %cst_126 = arith.constant dense<0.000000e+00> : vector<8x128xf32>
    %456 = tpu.matmul %453, %455, %cst_126 {dimension_numbers = #tpu.dot_dimension_numbers<[1], [0], [0], [1], [0, 0, 1, 1], [], []>} : vector<8x32xbf16>, vector<32x128xbf16>, vector<8x128xf32> -> vector<8x128xf32>
    %cst_127 = arith.constant 5.000000e-01 : f32
    %457 = vector.broadcast %cst_127 : f32 to vector<8x128xf32>
    %458 = arith.mulf %457, %456 : vector<8x128xf32>
    %cst_128 = arith.constant 4.471500e-02 : f32
    %459 = vector.broadcast %cst_128 : f32 to vector<8x128xf32>
    %460 = arith.mulf %459, %456 : vector<8x128xf32>
    %461 = arith.mulf %460, %456 : vector<8x128xf32>
    %462 = arith.mulf %461, %456 : vector<8x128xf32>
    %463 = arith.addf %456, %462 : vector<8x128xf32>
    %cst_129 = arith.constant 0.797884583 : f32
    %464 = vector.broadcast %cst_129 : f32 to vector<8x128xf32>
    %465 = arith.mulf %464, %463 : vector<8x128xf32>
    %466 = math.tanh %465 : vector<8x128xf32>
    %cst_130 = arith.constant 1.000000e+00 : f32
    %467 = vector.broadcast %cst_130 : f32 to vector<8x128xf32>
    %468 = arith.addf %467, %466 : vector<8x128xf32>
    %469 = arith.mulf %458, %468 : vector<8x128xf32>
    %470 = arith.truncf %469 : vector<8x128xf32> to vector<8x128xbf16>
    %c1_131 = arith.constant 1 : index
    %c0_132 = arith.constant 0 : index
    %c0_133 = arith.constant 0 : index
    %471 = vector.load %arg9[%c1_131, %c0_132, %c0_133] : memref<2x128x32xbf16, #tpu.memory_space<vmem>>, vector<1x128x32xbf16>
    %472 = vector.shape_cast %471 : vector<1x128x32xbf16> to vector<128x32xbf16>
    %cst_134 = arith.constant dense<0.000000e+00> : vector<8x32xf32>
    %473 = tpu.matmul %470, %472, %cst_134 {dimension_numbers = #tpu.dot_dimension_numbers<[1], [0], [0], [1], [0, 0, 1, 1], [], []>} : vector<8x128xbf16>, vector<128x32xbf16>, vector<8x32xf32> -> vector<8x32xf32>
    %474 = arith.addf %432, %473 : vector<8x32xf32>
    %c0_135 = arith.constant 0 : index
    %c0_136 = arith.constant 0 : index
    %475 = vector.load %arg10[%c0_135, %c0_136] : memref<1x32xf32, #tpu.memory_space<vmem>>, vector<1x32xf32>
    %cst_137 = arith.constant dense<0.000000e+00> : vector<8xf32>
    %476 = vector.multi_reduction <add>, %474, %cst_137 [1] : vector<8x32xf32> to vector<8xf32>
    %477 = vector.shape_cast %476 : vector<8xf32> to vector<8x1xf32>
    %cst_138 = arith.constant 3.200000e+01 : f32
    %478 = vector.broadcast %cst_138 : f32 to vector<8x1xf32>
    %479 = arith.divf %477, %478 : vector<8x1xf32>
    %480 = vector.broadcast %479 : vector<8x1xf32> to vector<8x32xf32>
    %481 = arith.subf %474, %480 : vector<8x32xf32>
    %482 = arith.mulf %481, %481 : vector<8x32xf32>
    %cst_139 = arith.constant dense<0.000000e+00> : vector<8xf32>
    %483 = vector.multi_reduction <add>, %482, %cst_139 [1] : vector<8x32xf32> to vector<8xf32>
    %484 = vector.shape_cast %483 : vector<8xf32> to vector<8x1xf32>
    %cst_140 = arith.constant 3.200000e+01 : f32
    %485 = vector.broadcast %cst_140 : f32 to vector<8x1xf32>
    %486 = arith.divf %484, %485 : vector<8x1xf32>
    %cst_141 = arith.constant 9.99999974E-6 : f32
    %487 = vector.broadcast %cst_141 : f32 to vector<8x1xf32>
    %488 = arith.addf %486, %487 : vector<8x1xf32>
    %489 = math.rsqrt %488 : vector<8x1xf32>
    %490 = vector.broadcast %489 : vector<8x1xf32> to vector<8x32xf32>
    %491 = arith.mulf %481, %490 : vector<8x32xf32>
    %492 = vector.broadcast %475 : vector<1x32xf32> to vector<8x32xf32>
    %493 = arith.mulf %491, %492 : vector<8x32xf32>
    %494 = arith.truncf %493 : vector<8x32xf32> to vector<8x32xbf16>
    %c0_142 = arith.constant 0 : index
    %c0_143 = arith.constant 0 : index
    %495 = vector.load %arg11[%c0_142, %c0_143] : memref<32x256xbf16, #tpu.memory_space<vmem>>, vector<32x256xbf16>
    %cst_144 = arith.constant dense<0.000000e+00> : vector<8x256xf32>
    %496 = tpu.matmul %494, %495, %cst_144 {dimension_numbers = #tpu.dot_dimension_numbers<[1], [0], [0], [1], [0, 0, 1, 1], [], []>} : vector<8x32xbf16>, vector<32x256xbf16>, vector<8x256xf32> -> vector<8x256xf32>
    %c0_145 = arith.constant 0 : index
    %c0_146 = arith.constant 0 : index
    %c0_147 = arith.constant 0 : index
    %497 = vector.load %arg12[%c0_145, %c0_146, %c0_147] : memref<1x8x256xf32, #tpu.memory_space<vmem>>, vector<1x8x256xf32>
    %498 = vector.shape_cast %497 : vector<1x8x256xf32> to vector<8x256xf32>
    %499 = vector.shape_cast %496 : vector<8x256xf32> to vector<1x8x256xf32>
    tpu.vector_store %arg12[%c0_145, %c0_146, %c0_147], %499 {strides = array<i32>} : memref<1x8x256xf32, #tpu.memory_space<vmem>>, vector<1x8x256xf32>,
    return
  }
  func.func @transform_0(%arg0: i32) -> (i32, i32, i32) {
    %c0_i32 = arith.constant 0 : i32
    %c0_i32_0 = arith.constant 0 : i32
    %c0_i32_1 = arith.constant 0 : i32
    return %arg0, %c0_i32, %c0_i32_0 : i32, i32, i32
  }
  func.func @transform_1(%arg0: i32) -> (i32, i32) {
    %c0_i32 = arith.constant 0 : i32
    %c0_i32_0 = arith.constant 0 : i32
    %c0_i32_1 = arith.constant 0 : i32
    return %c0_i32, %c0_i32_0 : i32, i32
  }
  func.func @transform_2(%arg0: i32) -> (i32, i32) {
    %c0_i32 = arith.constant 0 : i32
    %c0_i32_0 = arith.constant 0 : i32
    %c0_i32_1 = arith.constant 0 : i32
    return %c0_i32, %c0_i32_0 : i32, i32
  }
  func.func @transform_3(%arg0: i32) -> (i32, i32, i32) {
    %c0_i32 = arith.constant 0 : i32
    %c0_i32_0 = arith.constant 0 : i32
    %c0_i32_1 = arith.constant 0 : i32
    %c0_i32_2 = arith.constant 0 : i32
    return %c0_i32, %c0_i32_0, %c0_i32_1 : i32, i32, i32
  }
  func.func @transform_4(%arg0: i32) -> (i32, i32, i32) {
    %c0_i32 = arith.constant 0 : i32
    %c0_i32_0 = arith.constant 0 : i32
    %c0_i32_1 = arith.constant 0 : i32
    %c0_i32_2 = arith.constant 0 : i32
    return %c0_i32, %c0_i32_0, %c0_i32_1 : i32, i32, i32
  }
  func.func @transform_5(%arg0: i32) -> (i32, i32, i32) {
    %c0_i32 = arith.constant 0 : i32
    %c0_i32_0 = arith.constant 0 : i32
    %c0_i32_1 = arith.constant 0 : i32
    %c0_i32_2 = arith.constant 0 : i32
    return %c0_i32, %c0_i32_0, %c0_i32_1 : i32, i32, i32
  }
  func.func @transform_6(%arg0: i32) -> (i32, i32, i32) {
    %c0_i32 = arith.constant 0 : i32
    %c0_i32_0 = arith.constant 0 : i32
    %c0_i32_1 = arith.constant 0 : i32
    %c0_i32_2 = arith.constant 0 : i32
    return %c0_i32, %c0_i32_0, %c0_i32_1 : i32, i32, i32
  }
  func.func @transform_7(%arg0: i32) -> (i32, i32, i32) {
    %c0_i32 = arith.constant 0 : i32
    %c0_i32_0 = arith.constant 0 : i32
    %c0_i32_1 = arith.constant 0 : i32
    %c0_i32_2 = arith.constant 0 : i32
    return %c0_i32, %c0_i32_0, %c0_i32_1 : i32, i32, i32
  }
  func.func @transform_8(%arg0: i32) -> (i32, i32, i32) {
    %c0_i32 = arith.constant 0 : i32
    %c0_i32_0 = arith.constant 0 : i32
    %c0_i32_1 = arith.constant 0 : i32
    %c0_i32_2 = arith.constant 0 : i32
    return %c0_i32, %c0_i32_0, %c0_i32_1 : i32, i32, i32
  }
  func.func @transform_9(%arg0: i32) -> (i32, i32) {
    %c0_i32 = arith.constant 0 : i32
    %c0_i32_0 = arith.constant 0 : i32
    %c0_i32_1 = arith.constant 0 : i32
    return %c0_i32, %c0_i32_0 : i32, i32
  }
  func.func @transform_10(%arg0: i32) -> (i32, i32) {
    %c0_i32 = arith.constant 0 : i32
    %c0_i32_0 = arith.constant 0 : i32
    %c0_i32_1 = arith.constant 0 : i32
    return %c0_i32, %c0_i32_0 : i32, i32
  }
  func.func @transform_11(%arg0: i32) -> (i32, i32, i32) {
    %c0_i32 = arith.constant 0 : i32
    %c0_i32_0 = arith.constant 0 : i32
    %c0_i32_1 = arith.constant 0 : i32
    return %arg0, %c0_i32, %c0_i32_0 : i32, i32, i32
  }
}

</mosaic_0001>

<bundles_post_ra>
// kernel: _lambda_.1
= control target key start
LH: loop header
LB: loop body
LE: loop exit
PB: predicated region body
PF: predicated region fallthrough
CT: control target
= control target key end

     0   :  { %16 = vsyncpa [#allocation4], 0  ;;  %s4144_s0 = inlined_call_operand.vmem [shape: f32[2,8,32], index: 0, kind: input, shape index: {}]   ;;  %s4145_s1 = inlined_call_operand.vmem [shape: f32[8,4], index: 1, kind: input, shape index: {}]   ;;  %s4146_s2 = inlined_call_operand.hbm [shape: f32[8,4], index: 2, kind: input, shape index: {}]   ;;  %s4147_s3 = inlined_call_operand.vmem [shape: f32[2,1,32], index: 3, kind: input, shape index: {}, may-alias: {3,6}]   ;;  %s4148_s4 = inlined_call_operand.vmem [shape: bf16[2,32,96], index: 4, kind: input, shape index: {}]   ;;  %s4149_s5 = inlined_call_operand.vmem [shape: bf16[2,32,32], index: 5, kind: input, shape index: {}]   ;;  %s4150_s6 = inlined_call_operand.vmem [shape: f32[2,1,32], index: 6, kind: input, shape index: {}, may-alias: {3,6}]   ;;  %s4151_s7 = inlined_call_operand.vmem [shape: bf16[2,32,128], index: 7, kind: input, shape index: {}]   ;;  %s4152_s8 = inlined_call_operand.vmem [shape: bf16[2,128,32], index: 8, kind: input, shape index: {}]   ;;  %s4153_s9 = inlined_call_operand.vmem [shape: f32[1,32], index: 9, kind: input, shape index: {}]   ;;  %s4154_s10 = inlined_call_operand.vmem [shape: bf16[32,256], index: 10, kind: input, shape index: {}]   ;;  %s4155_s11 = inlined_call_operand.hbm [shape: f32[2,8,256], index: 11, kind: output, shape index: {}]  }
   0x1   :  { %17 = vsyncpa [#allocation5], 0 }
   0x2   :  { %19 = vsyncpa [#allocation5 + $0x1], 0  ;;  %s3348_s17 = smov 0   ;;  %s3350_s18 = smov 0  }
   0x3   :  { %s3352_s19 = smov 0   ;;  %s3354_s20 = smov 0  }
   0x4 LB: > { %s3369_s21 = sadd.s32 4294967295, %s3251_s20   ;;  %s2638_s22 = sadd.s32 4294967294, %s3251_s20   ;;  %s3251_s20 = sphi %s3354_s20, %s4213_s20   ;;  %s3247_s19 = sphi %s3352_s19, %s4212_s19   ;;  %s3243_s18 = sphi %s3350_s18, %s4211_s18   ;;  %s3239_s17 = sphi %s3348_s17, %s4210_s17  }
   0x5   : > { %s3373_s23 = sadd.s32 1, %s3251_s20   ;;  %s268_s24 = sadd.s32 1, %s3247_s19 }
   0x6   : > { %s265_s25 = ssub.s32 %s3251_s20, %s3373_s23  ;;  %p278_p0 = scmp.ne.s32.totalorder %s3247_s19, %s3243_s18 }
   0x7   : > { %p266_p1 = scmp.eq.s32.totalorder %s265_s25, 0  ;;  %p279_p2 = scmp.eq.s32.totalorder %s3369_s21, 1 }
   0x8   : > { %p284_p3 = scmp.ne.s32.totalorder %s3243_s18, %s3239_s17  ;;  %p285_p4 = scmp.eq.s32.totalorder %s2638_s22, 1 }
   0x9   : > { %s3384_s26 = scalar_select %p266_p1, %s3247_s19, %s268_s24  }
   0xa   : > { %p3386_p5 = por %p279_p2, %p278_p0  ;;  %p3390_p6 = por %p285_p4, %p284_p3 }
   0xb   : > { %4178 = sst [smem:[#allocation9_spill]] %s3384_s26  ;;  %p2639_p7 = scmp.ge.s32.totalorder %s3251_s20, 1 }
   0xc   : > { %s4179_s27 = scalar_select %p3386_p5, 1, 0 }
   0xd   : > { %s4180_s28 = scalar_select %p3390_p6, 1, 0 }
   0xe   : > { %p292_p8 = scmp.lt.s32.totalorder %s3251_s20, 3  ;;  %p4156_p9 = scmp.eq.s32.totalorder %s3369_s21, 0 }
   0xf   : > { %s3253_s30 = smov [#allocation3]   ;;  %s3157_s16 = scalar_lea.hbm %s4146_s2, 128 }
  0x10   : > { %p3397_p10 = pnand %p2639_p7, %p292_p8  ;;  %s308_s12 = sshll.u32 %s3253_s30, 4  ;;  %s309_s12 = int_to_ptr.vmem [resolvable:$true] %s308_s12 }
  0x11   : > { %p3158_p13 = scmp.ne.s32.totalorder %s4146_s2, %s3157_s16  ;;  %p3164_p3 = scmp.lt.u32.totalorder %s3157_s16, %s4146_s2 }
  0x12   : > { %s4181_s29 = scalar_select %p3397_p10, 1, 0 }
  0x13   : > { %p3000_p11 = pneg %p3397_p10 }
  0x15   : > { %p3405_p12 = pnand %p4156_p9, %p3000_p11 }
  0x17   : > { %p3159_p0 = pneg %p3405_p12 }
  0x19   : > { %p3160_p1 = pnand %p3159_p0, %p3158_p13 }
  0x1b   : > { %p3161_p2 = pneg %p3160_p1 }
  0x1d   : > { %p3166_p4 = pnand %p3164_p3, %p3161_p2 }
  0x1f   : > { %3169 = shalt.err (!%p3166_p4)
}
  0x20   : > { %s3170_s26 = scalar_lea.vmem %s309_s12, 128  ;;  %p3178_p9 = scmp.lt.s32.totalorder %s309_s12, %s309_s12 }
  0x21   : > { %p3171_p7 = scmp.ne.s32.totalorder %s309_s12, %s3170_s26  ;;  %p3179_p6 = scmp.lt.s32.totalorder %s3170_s26, %s3170_s26 }
  0x23   : > { %p3173_p8 = pnand %p3171_p7, %p3159_p0  ;;  %p3180_p5 = por %p3179_p6, %p3178_p9 }
  0x25   : > { %p3174_p11 = pneg %p3173_p8 }
  0x27   : > { %p3181_p10 = pnand %p3180_p5, %p3174_p11 }
  0x29   : > { %3184 = shalt.err (!%p3181_p10)
}
  0x2a   : > { %3003 = dma.hbm_to_vmem [thread:$0]  (!%p3405_p12), %s4146_s2, 128, %s309_s12, [#allocation4]  }
  0x2b   : > { %p4183_p13 = scmp.ne.s32.totalorder %s4181_s29, 0 }
  0x2c   : > { %p4184_p1 = scmp.eq.s32.totalorder (!%p4183_p13), %s3369_s21, 0 }
  0x2d   : > { %352 = sbr.rel (%p4183_p13) target bundleno = 6484 (0x1954), region = 64 }
  0x34   : > { %3230 = dma.done.wait (%p4184_p1), [#allocation4], 128   ;;  %p4185_p0 = pmov %p4184_p1 }
  0x35   : > { %p391_p6 = scmp.lt.s32.totalorder %s3369_s21, 1  ;;  %vm407_vm0 = vcmask 261120   ;;  %v3077_v7 = vld [vmem:[%s4148_s4] sm:$0xff]   ;;  %v3254_v8 = vmov 0.0   ;;  %vm3255_vm1 = vmmov 0   ;;  %v3078_v9 = vld [vmem:[%s4148_s4 + $0x8] sm:$0xff]  }
  0x36   : > { %3232 = vsyncadd (%p4185_p0), [#allocation4], 4294967168  ;;  %2810 = vmatprep.subr.bf16.mxu1 %v3254_v8  ;;  %2814 = vmatprep.mubr.msk.bf16.mxu1 %vm3255_vm1, %v3254_v8  ;;  %v398_v10 = vld [vmem:[#allocation3] sm:$0xff]  ;;  %v3463_v11 = vld [vmem:[%s4145_s1] sm:$0xff]  ;;  %s3258_s22 = smov 20   ;;  %s3259_s13 = smov 44  }
  0x37   : > { %s392_s26 = scalar_select %p391_p6, %s3369_s21, 1  ;;  %2811 = vmatpush3.bf16.msra.mxu1 %v3077_v7  ;;  %2824 = vmatprep.subr.bf16.mxu0 %v3254_v8  ;;  %v3466_v12 = vmul.f32 0.35355338, %v3463_v11  ;;  %v3471_v13 = vmul.f32 0.35355338, %v398_v10  ;;  %vm515_vm2 = vcmask 31744  }
  0x38   : > { %2812 = vmatprep.subr.bf16.mxu1 %v3254_v8  ;;  %2826 = vmatprep.mubr.msk.bf16.mxu0 %vm3255_vm1, %v3254_v8  ;;  %s3261_s29 = smov 28   ;;  %s3262_s12 = smov 12   ;;  %v2646_v18 = vld [vmem:[%s4147_s3] ss:$0 sm:$0xff]  ;;  %vm556_vm3 = vcmask 64512   ;;  %vm623_vm5 = vcmask 1043456  }
  0x39   : > { %s2645_s16 = sshll.u32 %s392_s26, 3  ;;  %s3256_s26 = smov 36   ;;  %vm851_vm6 = vcmask 130112   ;;  %vm1036_vm7 = vcmask 195712   ;;  %vm1221_vm8 = vcmask 261312  }
  0x3a   : > { %s394_s24 = scalar_lea.vmem %s4144_s0, %s2645_s16  ;;  %523 = vrot.lane.b32.xlu1 %v398_v10, %s3256_s26  ;;  %s4160_s16 = smov 4  }
  0x3b   : > { %v3436_v0 = vld [vmem:[%s394_s24] sm:$0xff]  ;;  %2813 = vmatpush3.bf16.msra.mxu1 %v3078_v9  ;;  %s3260_s24 = smov 60   ;;  %s3263_s25 = smov 32  }
  0x3c   : > { %v408_v1 = vsel %vm407_vm0, %v3436_v0, 0.0  ;;  %2818 = vmatprep.subr.bf16.mxu1 %v3254_v8  ;;  %s3264_s30 = smov 52   ;;  %s4170_s14 = smov 40  }
  0x3d   : > { %409 = vadd.xlane.f32.xlu0 %v408_v1  ;;  %s4176_s15 = smov 8   ;;  %p4207_p9 = scmp.ne.s32.totalorder %s4179_s27, 0 }
  0x3e   : > { %536 = vrot.lane.b32.xlu1 %v3463_v11, %s3256_s26  ;;  %s4172_s26 = smov 48  }
  0x42   : > { %707 = vrot.lane.b32.xlu1 %v398_v10, %s3259_s13 }
  0x46   : > { %720 = vrot.lane.b32.xlu1 %v3463_v11, %s3259_s13  ;;  %s4175_s13 = smov 16  }
  0x4a   : > { %672 = vrot.lane.b32.xlu1 %v3471_v13, %s3262_s12 }
  0x4e   : > { %685 = vrot.lane.b32.xlu1 %v3466_v12, %s3262_s12  ;;  %s3270_s12 = smov 124  }
  0x52   : > { %892 = vrot.lane.b32.xlu1 %v398_v10, %s3264_s30 }
  0x56   : > { %905 = vrot.lane.b32.xlu1 %v3463_v11, %s3264_s30  ;;  %s4159_s30 = smov 100  }
  0x5a   : > { %870 = vrot.lane.b32.xlu1 %v3466_v12, %s3258_s22 }
  0x5e   : > { %1090 = vrot.lane.b32.xlu1 %v3463_v11, %s3260_s24 }
  0x62   : > { %1055 = vrot.lane.b32.xlu1 %v3466_v12, %s3261_s29 }
  0x66   : > { %532 = vrot.lane.b32.xlu1 %v398_v10, %s3263_s25 }
  0x6a   : > { %703 = vrot.lane.b32.xlu1 %v3463_v11, %s4170_s14 }
  0x6e   : > { %681 = vrot.lane.b32.xlu1 %v3471_v13, %s4176_s15 }
  0x72   : > { %901 = vrot.lane.b32.xlu1 %v398_v10, %s4172_s26 }
  0x76   : > { %866 = vrot.lane.b32.xlu1 %v3471_v13, %s4175_s13 }
  0xac   : > { %v3507_v22 = vpop.permute.xlu1 %523 }
  0xb0   : > { %v3509_v23 = vpop.permute.xlu1 %536 }
  0xb4   : > { %v3511_v24 = vpop.permute.xlu1 %707 }
  0xb8   : > { %v3513_v25 = vpop.permute.xlu1 %720 }
  0xbc   : > { %v3515_v26 = vpop.permute.xlu1 %672 }
  0xc0   : > { %v3517_v27 = vpop.permute.xlu1 %685 }
  0xc4   : > { %v3531_v36 = vpop.permute.xlu1 %892 }
  0xc8   : > { %v3542_v39 = vpop.permute.xlu1 %905 }
  0xca   : > { %v410_v2 = vpop.xlane.xlu0 %409 }
  0xcb   : > { %v412_v3 = vmul.f32 0.03125, %v410_v2 }
  0xcc   : > { %v3554_v44 = vpop.permute.xlu1 %870 }
  0xcd   : > { %v3441_v4 = vsub.f32 %v3436_v0, %v412_v3 }
  0xcf   : > { %v414_v5 = vmul.f32 %v3441_v4, %v3441_v4 }
  0xd0   : > { %v3566_v48 = vpop.permute.xlu1 %1090 }
  0xd1   : > { %v415_v6 = vsel %vm407_vm0, %v414_v5, 0.0 }
  0xd2   : > { %416 = vadd.xlane.f32.xlu0 %v415_v6 }
  0xd4   : > { %v3580_v52 = vpop.permute.xlu1 %1055 }
  0xd8   : > { %v3590_v56 = vpop.permute.xlu1 %532 }
  0xdc   : > { %v3594_v58 = vpop.permute.xlu1 %703 }
  0xe0   : > { %v3598_v60 = vpop.permute.xlu1 %681 }
  0xe4   : > { %v3602_v62 = vpop.permute.xlu1 %901 }
  0xe8   : > { %502 = vrot.lane.b32.xlu0 %v3466_v12, %s4160_s16  ;;  %v3606_v1 = vpop.permute.xlu1 %866 }
  0xec   : > { %857 = vrot.lane.b32.xlu0 %v3471_v13, %s3258_s22  ;;  %s4171_s22 = smov 56  }
  0xed   : > { %1086 = vrot.lane.b32.xlu1 %v398_v10, %s4171_s22 }
  0xf0   : > { %1077 = vrot.lane.b32.xlu0 %v398_v10, %s3260_s24  ;;  %s4164_s24 = smov 96  }
  0xf4   : > { %1042 = vrot.lane.b32.xlu0 %v3471_v13, %s3261_s29  ;;  %s4161_s29 = smov 92  }
  0xf8   : > { %518 = vrot.lane.b32.xlu0 %v3463_v11, %s3263_s25  ;;  %s4174_s25 = smov 24  }
  0xfc   : > { %491 = vrot.lane.b32.xlu0 %v3471_v13, %s4160_s16 }
 0x100   : > { %716 = vrot.lane.b32.xlu0 %v398_v10, %s4170_s14 }
 0x104   : > { %668 = vrot.lane.b32.xlu0 %v3466_v12, %s4176_s15 }
 0x108   : > { %888 = vrot.lane.b32.xlu0 %v3463_v11, %s4172_s26 }
 0x10c   : > { %853 = vrot.lane.b32.xlu0 %v3466_v12, %s4175_s13 }
 0x15f   : > { %v417_v14 = vpop.xlane.xlu0 %416  ;;  %v3610_v3 = vpop.permute.xlu1 %1086 }
 0x160   : > { %v418_v15 = vmul.f32 0.03125, %v417_v14 }
 0x162   : > { %v419_v16 = vadd.f32 1e-05, %v418_v15 }
 0x163   : > { %v3527_v34 = vpop.permute.xlu0 %502 }
 0x164   : > { %3111 = vrsqrt.f32 %v419_v16 }
 0x167   : > { %v3556_v45 = vpop.permute.xlu0 %857 }
 0x16b   : > { %v3568_v49 = vpop.permute.xlu0 %1077 }
 0x16e   : > { %v3112_v17 = vpop.eup %3111 }
 0x16f   : > { %v421_v19 = vmul.f32 %v3112_v17, %v3441_v4  ;;  %v3582_v53 = vpop.permute.xlu0 %1042 }
 0x171   : > { %v428_v20 = vmul.f32 %v2646_v18, %v421_v19 }
 0x173   : > { %v429_v21 = vpack.c.bf16 %v428_v20, %v428_v20  ;;  %v3592_v57 = vpop.permute.xlu0 %518 }
 0x175   : > { %2815 = vmatmul.mubr.msk.bf16.vlgmr.msra.gmra.mrb[0].mxu1 %vm407_vm0, %v429_v21 }
 0x176   : > { %2820 = vmatprep.mubr.msk.bf16.mxu1 %vm3255_vm1, %v3254_v8 }
 0x177   : > { %v3596_v59 = vpop.permute.xlu0 %491 }
 0x17b   : > { %v3600_v61 = vpop.permute.xlu0 %716 }
 0x17f   : > { %v3604_v63 = vpop.permute.xlu0 %668 }
 0x183   : > { %v3608_v2 = vpop.permute.xlu0 %888 }
 0x187   : > { %v3612_v4 = vpop.permute.xlu0 %853 }
 0x248   : > { %v3519_v28 = vpop.f32.mrb[0].mxu1 }
 0x249   : > { %v2816_v29 = vpop.f32.mrb[1].mxu1  ;;  %v539_v30 = vmul.f32 %v3509_v23, %v3519_v28  ;;  %v526_v31 = vmul.f32 %v3507_v22, %v3519_v28  ;;  %v505_v35 = vmul.f32 %v3527_v34, %v3519_v28  ;;  %v710_v37 = vmul.f32 %v3511_v24, %v3519_v28 }
 0x24a   : > { %v486_v32 = vpop.f32.mrb[2].mxu1  ;;  %v723_v38 = vmul.f32 %v3513_v25, %v3519_v28  ;;  %v675_v40 = vmul.f32 %v3515_v26, %v3519_v28  ;;  %v688_v41 = vmul.f32 %v3517_v27, %v3519_v28  ;;  %v895_v42 = vmul.f32 %v3531_v36, %v3519_v28 }
 0x24b   : > { %541 = vrot.lane.b32.xlu1 %v539_v30, %s3270_s12  ;;  %528 = vrot.lane.b32.xlu0 %v526_v31, %s3270_s12  ;;  %v2817_v33 = vpop.f32.mrb[3].mxu1  ;;  %v908_v43 = vmul.f32 %v3542_v39, %v3519_v28  ;;  %v873_v46 = vmul.f32 %v3554_v44, %v3519_v28  ;;  %v860_v47 = vmul.f32 %v3556_v45, %v3519_v28 }
 0x24c   : > { %v1093_v50 = vmul.f32 %v3566_v48, %v3519_v28  ;;  %v1080_v51 = vmul.f32 %v3568_v49, %v3519_v28  ;;  %v1058_v54 = vmul.f32 %v3580_v52, %v3519_v28  ;;  %v1045_v55 = vmul.f32 %v3582_v53, %v3519_v28 }
 0x24d   : > { %v535_v5 = vmul.f32 %v3590_v56, %v3519_v28  ;;  %v521_v6 = vmul.f32 %v3592_v57, %v3519_v28  ;;  %v500_v14 = vmul.f32 %v3519_v28, %v3471_v13  ;;  %v494_v18 = vmul.f32 %v3596_v59, %v3519_v28 }
 0x24e   : > { %v719_v19 = vmul.f32 %v3600_v61, %v3519_v28  ;;  %v706_v20 = vmul.f32 %v3594_v58, %v3519_v28  ;;  %v684_v32 = vmul.f32 %v3598_v60, %v3519_v28  ;;  %v671_v33 = vmul.f32 %v3604_v63, %v3519_v28 }
 0x24f   : > { %1073 = vrot.lane.b32.xlu0 %v3463_v11, %s4171_s22  ;;  %507 = vrot.lane.b32.xlu1 %v505_v35, %s3270_s12 }
 0x253   : > { %712 = vrot.lane.b32.xlu0 %v710_v37, %s3270_s12  ;;  %725 = vrot.lane.b32.xlu1 %v723_v38, %s3270_s12 }
 0x257   : > { %677 = vrot.lane.b32.xlu0 %v675_v40, %s3270_s12  ;;  %690 = vrot.lane.b32.xlu1 %v688_v41, %s3270_s12  ;;  %v904_v41 = vmul.f32 %v3602_v62, %v3519_v28 }
 0x25b   : > { %897 = vrot.lane.b32.xlu0 %v895_v42, %s3270_s12  ;;  %910 = vrot.lane.b32.xlu1 %v908_v43, %s3270_s12  ;;  %v891_v42 = vmul.f32 %v3608_v2, %v3519_v28 }
 0x25f   : > { %875 = vrot.lane.b32.xlu1 %v873_v46, %s3270_s12  ;;  %862 = vrot.lane.b32.xlu0 %v860_v47, %s3270_s12 }
 0x263   : > { %1095 = vrot.lane.b32.xlu1 %v1093_v50, %s3270_s12  ;;  %1082 = vrot.lane.b32.xlu0 %v1080_v51, %s3270_s12  ;;  %v869_v51 = vmul.f32 %v3606_v1, %v3519_v28 }
 0x267   : > { %1051 = vrot.lane.b32.xlu1 %v3471_v13, %s4174_s25  ;;  %1038 = vrot.lane.b32.xlu0 %v3466_v12, %s4174_s25 }
 0x26b   : > { %1060 = vrot.lane.b32.xlu1 %v1058_v54, %s3270_s12  ;;  %1047 = vrot.lane.b32.xlu0 %v1045_v55, %s3270_s12  ;;  %v856_v54 = vmul.f32 %v3612_v4, %v3519_v28 }
 0x2bd   : > { %v542_v7 = vpop.permute.xlu1 %541  ;;  %v529_v9 = vpop.permute.xlu0 %528 }
 0x2be   : > { %v544_v10 = vadd.f32 %v542_v7, %v535_v5  ;;  %v531_v11 = vsub.f32 %v521_v6, %v529_v9  ;;  %v1089_v9 = vmul.f32 %v3610_v3, %v3519_v28 }
 0x2c0   : > { %550 = vrot.lane.b32.xlu1 %v544_v10, %s4159_s30  ;;  %546 = vrot.lane.b32.xlu0 %v531_v11, %s4164_s24  ;;  %s4162_s30 = smov 88   ;;  %s3280_s24 = smov 112  }
 0x2c1   : > { %v508_v15 = vpop.permute.xlu1 %507  ;;  %v3622_v16 = vpop.permute.xlu0 %1073 }
 0x2c2   : > { %v510_v17 = vadd.f32 %v508_v15, %v500_v14  ;;  %v1076_v10 = vmul.f32 %v3622_v16, %v3519_v28 }
 0x2c4   : > { %512 = vrot.lane.b32.xlu1 %v510_v17, %s4160_s16  ;;  %496 = vrot.lane.b32.xlu0 %v494_v18, %s3270_s12  ;;  %s4163_s16 = smov 120  }
 0x2c5   : > { %v726_v21 = vpop.permute.xlu1 %725  ;;  %v713_v29 = vpop.permute.xlu0 %712 }
 0x2c6   : > { %v728_v30 = vadd.f32 %v726_v21, %v719_v19  ;;  %v715_v31 = vsub.f32 %v706_v20, %v713_v29 }
 0x2c8   : > { %734 = vrot.lane.b32.xlu1 %v728_v30, %s4161_s29  ;;  %730 = vrot.lane.b32.xlu0 %v715_v31, %s4162_s30  ;;  %s4165_s29 = smov 84   ;;  %s4166_s30 = smov 80  }
 0x2c9   : > { %v691_v35 = vpop.permute.xlu1 %690  ;;  %v678_v37 = vpop.permute.xlu0 %677 }
 0x2ca   : > { %v693_v38 = vadd.f32 %v691_v35, %v684_v32  ;;  %v680_v40 = vsub.f32 %v671_v33, %v678_v37 }
 0x2cc   : > { %699 = vrot.lane.b32.xlu1 %v693_v38, %s3270_s12  ;;  %695 = vrot.lane.b32.xlu0 %v680_v40, %s4163_s16  ;;  %s4167_s16 = smov 116   ;;  %v489_v40 = vmul.f32 %v3519_v28, %v3466_v12 }
 0x2cd   : > { %v911_v43 = vpop.permute.xlu1 %910  ;;  %v898_v46 = vpop.permute.xlu0 %897 }
 0x2ce   : > { %v913_v47 = vadd.f32 %v911_v43, %v904_v41  ;;  %v900_v50 = vsub.f32 %v891_v42, %v898_v46 }
 0x2d0   : > { %919 = vrot.lane.b32.xlu1 %v913_v47, %s4165_s29  ;;  %915 = vrot.lane.b32.xlu0 %v900_v50, %s4166_s30  ;;  %s4168_s29 = smov 76   ;;  %s4177_s30 = smov 72  }
 0x2d1   : > { %v876_v55 = vpop.permute.xlu1 %875  ;;  %v863_v5 = vpop.permute.xlu0 %862 }
 0x2d2   : > { %v878_v6 = vadd.f32 %v876_v55, %v869_v51  ;;  %v865_v7 = vsub.f32 %v856_v54, %v863_v5 }
 0x2d4   : > { %884 = vrot.lane.b32.xlu1 %v878_v6, %s4167_s16  ;;  %880 = vrot.lane.b32.xlu0 %v865_v7, %s3280_s24  ;;  %s4169_s16 = smov 108  }
 0x2d5   : > { %v1096_v11 = vpop.permute.xlu1 %1095  ;;  %v1083_v14 = vpop.permute.xlu0 %1082 }
 0x2d6   : > { %v1098_v15 = vadd.f32 %v1096_v11, %v1089_v9  ;;  %v1085_v17 = vsub.f32 %v1076_v10, %v1083_v14 }
 0x2d8   : > { %1104 = vrot.lane.b32.xlu1 %v1098_v15, %s4168_s29  ;;  %1100 = vrot.lane.b32.xlu0 %v1085_v17, %s4177_s30  ;;  %s4173_s29 = smov 104   ;;  %s4190_s30 = smov 4  }
 0x2d9   : > { %v3658_v18 = vpop.permute.xlu1 %1051  ;;  %v3660_v19 = vpop.permute.xlu0 %1038 }
 0x2da   : > { %v1054_v20 = vmul.f32 %v3658_v18, %v3519_v28  ;;  %v1041_v21 = vmul.f32 %v3660_v19, %v3519_v28 }
 0x2dd   : > { %v1061_v29 = vpop.permute.xlu1 %1060  ;;  %v1048_v30 = vpop.permute.xlu0 %1047 }
 0x2de   : > { %v1063_v31 = vadd.f32 %v1061_v29, %v1054_v20  ;;  %v1050_v32 = vsub.f32 %v1041_v21, %v1048_v30 }
 0x2e0   : > { %1069 = vrot.lane.b32.xlu1 %v1063_v31, %s4169_s16  ;;  %1065 = vrot.lane.b32.xlu0 %v1050_v32, %s4173_s29  ;;  %s3285_s16 = smov 64   ;;  %s4198_s29 = smov 104  }
 0x332   : > { %v551_v33 = vpop.permute.xlu1 %550  ;;  %v547_v35 = vpop.permute.xlu0 %546 }
 0x333   : > { %v553_v37 = vsel %vm515_vm2, %v547_v35, %v551_v33 }
 0x334   : > { %v555_v38 = vpack.c.bf16 %v553_v37, %v553_v37 }
 0x336   : > { %v513_v41 = vpop.permute.xlu1 %512  ;;  %v497_v42 = vpop.permute.xlu0 %496  ;;  %v561_v43 = vsel %vm556_vm3, %v555_v38, 0 }
 0x337   : > { %v499_v46 = vsub.f32 %v489_v40, %v497_v42  ;;  %2819 = vmatpush3.bf16.xpose.msra.mxu1 %v561_v43 }
 0x338   : > { %2830 = vmatprep.subr.bf16.mxu1 %v3254_v8 }
 0x339   : > { %v516_v47 = vsel %vm515_vm2, %v499_v46, %v513_v41 }
 0x33a   : > { %v735_v50 = vpop.permute.xlu1 %734  ;;  %v731_v51 = vpop.permute.xlu0 %730  ;;  %v554_v55 = vpack.c.bf16 %v516_v47, %v516_v47  ;;  %v401_v47 = vlaneseq }
 0x33b   : > { %v737_v54 = vsel %vm515_vm2, %v731_v51, %v735_v50 }
 0x33c   : > { %v739_v5 = vpack.c.bf16 %v737_v54, %v737_v54  ;;  %v402_v50 = vshrl.u32 %v401_v47, 7  ;;  %v404_v51 = vand.u32 127, %v401_v47 }
 0x33e   : > { %v700_v6 = vpop.permute.xlu1 %699  ;;  %2821 = vmatmul.mubr.msk.bf16.vlgmr.msra.gmra.mrb[4].mxu1 %vm556_vm3, %v554_v55  ;;  %v696_v7 = vpop.permute.xlu0 %695  ;;  %v744_v9 = vsel %vm556_vm3, %v739_v5, 0  ;;  %vm3698_vm4 = vcmp.le.s32.totalorder %v404_v51, %v402_v50 }
 0x33f   : > { %2831 = vmatpush3.bf16.xpose.msra.mxu1 %v744_v9  ;;  %2832 = vmatprep.mubr.msk.bf16.mxu1 %vm3255_vm1, %v3254_v8  ;;  %v702_v10 = vsel %vm515_vm2, %v696_v7, %v700_v6 }
 0x340   : > { %2842 = vmatprep.subr.bf16.mxu1 %v3254_v8  ;;  %v738_v17 = vpack.c.bf16 %v702_v10, %v702_v10 }
 0x342   : > { %v920_v11 = vpop.permute.xlu1 %919  ;;  %v916_v14 = vpop.permute.xlu0 %915 }
 0x343   : > { %v922_v15 = vsel %vm515_vm2, %v916_v14, %v920_v11 }
 0x344   : > { %v924_v20 = vpack.c.bf16 %v922_v15, %v922_v15 }
 0x346   : > { %v885_v21 = vpop.permute.xlu1 %884  ;;  %2833 = vmatmul.mubr.msk.bf16.vlgmr.msra.gmra.mrb[8].mxu1 %vm556_vm3, %v738_v17  ;;  %v881_v29 = vpop.permute.xlu0 %880  ;;  %v929_v30 = vsel %vm556_vm3, %v924_v20, 0 }
 0x347   : > { %2843 = vmatpush3.bf16.xpose.msra.mxu1 %v929_v30  ;;  %2844 = vmatprep.mubr.msk.bf16.mxu1 %vm3255_vm1, %v3254_v8  ;;  %v887_v31 = vsel %vm515_vm2, %v881_v29, %v885_v21 }
 0x348   : > { %2854 = vmatprep.subr.bf16.mxu1 %v3254_v8  ;;  %v923_v37 = vpack.c.bf16 %v887_v31, %v887_v31 }
 0x34a   : > { %v1105_v32 = vpop.permute.xlu1 %1104  ;;  %v1101_v33 = vpop.permute.xlu0 %1100 }
 0x34b   : > { %v1107_v35 = vsel %vm515_vm2, %v1101_v33, %v1105_v32 }
 0x34c   : > { %v1109_v38 = vpack.c.bf16 %v1107_v35, %v1107_v35 }
 0x34e   : > { %2845 = vmatmul.mubr.msk.bf16.vlgmr.msra.gmra.mrb[12].mxu1 %vm556_vm3, %v923_v37  ;;  %v1114_v40 = vsel %vm556_vm3, %v1109_v38, 0 }
 0x34f   : > { %2855 = vmatpush3.bf16.xpose.msra.mxu1 %v1114_v40  ;;  %2856 = vmatprep.mubr.msk.bf16.mxu1 %vm3255_vm1, %v3254_v8 }
 0x350   : > { %2866 = vmatprep.subr.bf16.mxu1 %v3254_v8 }
 0x352   : > { %v1070_v41 = vpop.permute.xlu1 %1069  ;;  %v1066_v42 = vpop.permute.xlu0 %1065 }
 0x353   : > { %v1072_v43 = vsel %vm515_vm2, %v1066_v42, %v1070_v41 }
 0x354   : > { %v1108_v46 = vpack.c.bf16 %v1072_v43, %v1072_v43 }
 0x356   : > { %2857 = vmatmul.mubr.msk.bf16.vlgmr.msra.gmra.mrb[16].mxu1 %vm556_vm3, %v1108_v46 }
 0x357   : > { %2870 = vmatprep.mubr.msk.bf16.mxu1 %vm3255_vm1, %v3254_v8 }
 0x411   : > { %v597_v55 = vpop.f32.mrb[4].mxu1 }
 0x412   : > { %v603_v5 = vsel %vm3698_vm4, %v597_v55, -1e+30  ;;  %v2822_v6 = vpop.f32.mrb[5].mxu1 }
 0x413   : > { %v600_v7 = vpop.f32.mrb[6].mxu1  ;;  %v604_v9 = vsel %vm556_vm3, %v603_v5, -inf }
 0x414   : > { %605 = vmax.xlane.f32.xlu0 %v604_v9  ;;  %v2823_v10 = vpop.f32.mrb[7].mxu1 }
 0x419   : > { %v780_v11 = vpop.f32.mrb[8].mxu1 }
 0x41a   : > { %v786_v14 = vsel %vm3698_vm4, %v780_v11, -1e+30  ;;  %v2834_v15 = vpop.f32.mrb[9].mxu1 }
 0x41b   : > { %v783_v17 = vpop.f32.mrb[10].mxu1  ;;  %v787_v20 = vsel %vm556_vm3, %v786_v14, -inf }
 0x41c   : > { %788 = vmax.xlane.f32.xlu1 %v787_v20  ;;  %v2835_v21 = vpop.f32.mrb[11].mxu1 }
 0x421   : > { %v965_v29 = vpop.f32.mrb[12].mxu1 }
 0x422   : > { %v971_v30 = vsel %vm3698_vm4, %v965_v29, -1e+30  ;;  %v2846_v31 = vpop.f32.mrb[13].mxu1 }
 0x423   : > { %v968_v32 = vpop.f32.mrb[14].mxu1  ;;  %v972_v33 = vsel %vm556_vm3, %v971_v30, -inf }
 0x424   : > { %973 = vmax.xlane.f32.xlu0 %v972_v33  ;;  %v2847_v35 = vpop.f32.mrb[15].mxu1 }
 0x429   : > { %v1150_v37 = vpop.f32.mrb[16].mxu1 }
 0x42a   : > { %v1156_v38 = vsel %vm3698_vm4, %v1150_v37, -1e+30  ;;  %v2858_v40 = vpop.f32.mrb[17].mxu1 }
 0x42b   : > { %v1153_v41 = vpop.f32.mrb[18].mxu1  ;;  %v1157_v42 = vsel %vm556_vm3, %v1156_v38, -inf }
 0x42c   : > { %1158 = vmax.xlane.f32.xlu0 %v1157_v42  ;;  %v2859_v43 = vpop.f32.mrb[19].mxu1 }
 0x4a1   : > { %v606_v46 = vpop.xlane.xlu0 %605 }
 0x4a2   : > { %v607_v47 = vsub.f32 %v603_v5, %v606_v46  ;;  %v616_v5 = vpack.c.bf16 %v3519_v28, %v3519_v28 }
 0x4a4   : > { %v608_v50 = vmul.f32 1.442695, %v607_v47 }
 0x4a6   : > { %3113 = vpow2.f32 %v608_v50 }
 0x4a9   : > { %v789_v51 = vpop.xlane.xlu1 %788 }
 0x4aa   : > { %v790_v55 = vsub.f32 %v786_v14, %v789_v51 }
 0x4ac   : > { %v791_v6 = vmul.f32 1.442695, %v790_v55 }
 0x4ae   : > { %3115 = vpow2.f32 %v791_v6 }
 0x4b0   : > { %v3114_v7 = vpop.eup %3113 }
 0x4b1   : > { %v610_v9 = vsel %vm556_vm3, %v3114_v7, 0.0  ;;  %v974_v10 = vpop.xlane.xlu0 %973 }
 0x4b2   : > { %611 = vadd.xlane.f32.xlu1 %v610_v9  ;;  %v975_v31 = vsub.f32 %v971_v30, %v974_v10 }
 0x4b4   : > { %v976_v32 = vmul.f32 1.442695, %v975_v31 }
 0x4b8   : > { %v3116_v11 = vpop.eup %3115 }
 0x4b9   : > { %v1159_v15 = vpop.xlane.xlu0 %1158  ;;  %v793_v17 = vsel %vm556_vm3, %v3116_v11, 0.0 }
 0x4ba   : > { %v1160_v20 = vsub.f32 %v1156_v38, %v1159_v15  ;;  %794 = vadd.xlane.f32.xlu0 %v793_v17 }
 0x4bc   : > { %v1161_v21 = vmul.f32 1.442695, %v1160_v20 }
 0x4be   : > { %3117 = vpow2.f32 %v1161_v21 }
 0x4bf   : > { %3119 = vpow2.f32 %v976_v32 }
 0x4c3   : > { %618 = vrot.lane.b32.xlu1 %v616_v5, %s3285_s16 }
 0x4c8   : > { %v3118_v14 = vpop.eup %3117 }
 0x4c9   : > { %v1163_v29 = vsel %vm556_vm3, %v3118_v14, 0.0  ;;  %v3120_v33 = vpop.eup %3119 }
 0x4ca   : > { %1164 = vadd.xlane.f32.xlu0 %v1163_v29  ;;  %v978_v35 = vsel %vm556_vm3, %v3120_v33, 0.0 }
 0x4e0   : > { %799 = vrot.lane.b32.xlu0 %v616_v5, %s4171_s22  ;;  %s4195_s22 = smov 84  }
 0x4e7   : > { %979 = vadd.xlane.f32.xlu1 %v978_v35 }
 0x4f8   : > { %984 = vrot.lane.b32.xlu1 %v616_v5, %s4172_s26  ;;  %s4191_s26 = smov 88  }
 0x4fc   : > { %1169 = vrot.lane.b32.xlu1 %v616_v5, %s4170_s14  ;;  %s4188_s14 = smov 96  }
 0x53f   : > { %v612_v28 = vpop.xlane.xlu1 %611 }
 0x540   : > { %3121 = vrcp.f32 %v612_v28 }
 0x543   : > { %v619_v37 = vpop.permute.xlu1 %618 }
 0x544   : > { %v625_v38 = vsel %vm623_vm5, %v619_v37, 0 }
 0x545   : > { %2825 = vmatpush3.bf16.msra.mxu0 %v625_v38 }
 0x546   : > { %2836 = vmatprep.subr.bf16.mxu0 %v3254_v8 }
 0x547   : > { %v795_v40 = vpop.xlane.xlu0 %794 }
 0x548   : > { %3123 = vrcp.f32 %v795_v40  ;;  %v3080_v40 = vld [vmem:[%s4149_s5 + $0x8] sm:$0xff]  }
 0x54a   : > { %v3122_v30 = vpop.eup %3121 }
 0x54b   : > { %v614_v41 = vmul.f32 %v3122_v30, %v3114_v7  ;;  %v3079_v30 = vld [vmem:[%s4149_s5] sm:$0xff]  }
 0x54c   : > { %2867 = vmatpush3.bf16.msra.mxu1 %v3079_v30 }
 0x54d   : > { %v615_v42 = vpack.c.bf16 %v614_v41, %v614_v41  ;;  %2868 = vmatprep.subr.bf16.mxu1 %v3254_v8 }
 0x54f   : > { %2827 = vmatmul.mubr.msk.bf16.vlgmr.msra.gmra.mrb[0].mxu0 %vm556_vm3, %v615_v42 }
 0x550   : > { %2838 = vmatprep.mubr.msk.bf16.mxu0 %vm3255_vm1, %v3254_v8  ;;  %2869 = vmatpush3.bf16.msra.mxu1 %v3080_v40 }
 0x551   : > { %2882 = vmatprep.subr.bf16.mxu1 %v3254_v8 }
 0x552   : > { %v3124_v43 = vpop.eup %3123 }
 0x553   : > { %v797_v47 = vmul.f32 %v3124_v43, %v3116_v11 }
 0x555   : > { %v798_v55 = vpack.c.bf16 %v797_v47, %v797_v47 }
 0x557   : > { %v1165_v46 = vpop.xlane.xlu0 %1164 }
 0x55b   : > { %v800_v50 = vpop.permute.xlu0 %799 }
 0x55c   : > { %v805_v51 = vsel %vm623_vm5, %v800_v50, 0 }
 0x55d   : > { %2837 = vmatpush3.bf16.msra.mxu0 %v805_v51 }
 0x55e   : > { %2848 = vmatprep.subr.bf16.mxu0 %v3254_v8 }
 0x560   : > { %2839 = vmatmul.mubr.msk.bf16.vlgmr.msra.gmra.mrb[4].mxu0 %vm556_vm3, %v798_v55 }
 0x561   : > { %2850 = vmatprep.mubr.msk.bf16.mxu0 %vm3255_vm1, %v3254_v8 }
 0x574   : > { %v980_v6 = vpop.xlane.xlu1 %979 }
 0x575   : > { %3125 = vrcp.f32 %v980_v6 }
 0x576   : > { %3127 = vrcp.f32 %v1165_v46 }
 0x578   : > { %v985_v7 = vpop.permute.xlu1 %984 }
 0x579   : > { %v990_v9 = vsel %vm623_vm5, %v985_v7, 0 }
 0x57a   : > { %2849 = vmatpush3.bf16.msra.mxu0 %v990_v9 }
 0x57b   : > { %2860 = vmatprep.subr.bf16.mxu0 %v3254_v8 }
 0x57c   : > { %v1170_v15 = vpop.permute.xlu1 %1169 }
 0x57d   : > { %v1175_v21 = vsel %vm623_vm5, %v1170_v15, 0 }
 0x57f   : > { %v3126_v10 = vpop.eup %3125 }
 0x580   : > { %v982_v11 = vmul.f32 %v3126_v10, %v3120_v33  ;;  %v3128_v20 = vpop.eup %3127 }
 0x581   : > { %v1167_v5 = vmul.f32 %v3128_v20, %v3118_v14 }
 0x582   : > { %v983_v17 = vpack.c.bf16 %v982_v11, %v982_v11 }
 0x583   : > { %v1168_v29 = vpack.c.bf16 %v1167_v5, %v1167_v5 }
 0x584   : > { %2851 = vmatmul.mubr.msk.bf16.vlgmr.msra.gmra.mrb[8].mxu0 %vm556_vm3, %v983_v17 }
 0x585   : > { %2861 = vmatpush3.bf16.msra.mxu0 %v1175_v21  ;;  %2862 = vmatprep.mubr.msk.bf16.mxu0 %vm3255_vm1, %v3254_v8 }
 0x586   : > { %2874 = vmatprep.subr.bf16.mxu0 %v3254_v8 }
 0x58c   : > { %2863 = vmatmul.mubr.msk.bf16.vlgmr.msra.gmra.mrb[12].mxu0 %vm556_vm3, %v1168_v29 }
 0x58d   : > { %2878 = vmatprep.mubr.msk.bf16.mxu0 %vm3255_vm1, %v3254_v8 }
 0x622   : > { %v661_v31 = vpop.f32.mrb[0].mxu0 }
 0x623   : > { %667 = vst.msk [vmem:[#allocation2] sm:$0xff] %vm556_vm3, %v661_v31  ;;  %v2828_v32 = vpop.f32.mrb[1].mxu0 }
 0x624   : > { %v664_v33 = vpop.f32.mrb[2].mxu0 }
 0x625   : > { %v2829_v35 = vpop.f32.mrb[3].mxu0 }
 0x633   : > { %v841_v28 = vpop.f32.mrb[4].mxu0 }
 0x634   : > { %848 = vrot.lane.b32.xlu0 %v841_v28, %s4176_s15  ;;  %v2840_v37 = vpop.f32.mrb[5].mxu0  ;;  %s4189_s15 = smov 100  }
 0x635   : > { %v844_v38 = vpop.f32.mrb[6].mxu0  ;;  %v3082_v37 = vld [vmem:[%s4151_s7 + $0x8] sm:$0xff]  }
 0x636   : > { %v2841_v14 = vpop.f32.mrb[7].mxu0  ;;  %v3083_v38 = vld [vmem:[%s4152_s8] sm:$0xff]  }
 0x657   : > { %v1026_v41 = vpop.f32.mrb[8].mxu0 }
 0x658   : > { %1033 = vrot.lane.b32.xlu1 %v1026_v41, %s4175_s13  ;;  %v2852_v42 = vpop.f32.mrb[9].mxu0  ;;  %s4192_s13 = smov 92  }
 0x659   : > { %v1029_v43 = vpop.f32.mrb[10].mxu0  ;;  %v2661_v42 = vld [vmem:[%s4150_s6] ss:$0 sm:$0xff] }
 0x65a   : > { %v2853_v46 = vpop.f32.mrb[11].mxu0 }
 0x65f   : > { %v1211_v47 = vpop.f32.mrb[12].mxu0 }
 0x660   : > { %1218 = vrot.lane.b32.xlu0 %v1211_v47, %s4174_s25  ;;  %v2864_v50 = vpop.f32.mrb[13].mxu0  ;;  %s4193_s25 = smov 120  }
 0x661   : > { %v1214_v51 = vpop.f32.mrb[14].mxu0  ;;  %v3084_v50 = vld [vmem:[%s4152_s8 + $0x8] sm:$0xff]  }
 0x662   : > { %v2865_v55 = vpop.f32.mrb[15].mxu0  ;;  %v3085_v51 = vld [vmem:[%s4152_s8 + $0x10] sm:$0xff]  }
 0x663   : > { %v3086_v55 = vld [vmem:[%s4152_s8 + $0x18] sm:$0xff]  }
 0x6a6   : > { %v849_v6 = vpop.permute.xlu0 %848 }
 0x6a7   : > { %852 = vst.msk [vmem:[#allocation2] sm:$0xff] %vm851_vm6, %v849_v6  ;;  %v3087_v6 = vld [vmem:[%s4152_s8 + $0x20] sm:$0xff]  }
 0x6ca   : > { %v1034_v7 = vpop.permute.xlu1 %1033 }
 0x6cb   : > { %1037 = vst.msk [vmem:[#allocation2] sm:$0xff] %vm1036_vm7, %v1034_v7  ;;  %v3088_v7 = vld [vmem:[%s4152_s8 + $0x28] sm:$0xff]  }
 0x6d2   : > { %v1219_v9 = vpop.permute.xlu0 %1218 }
 0x6d3   : > { %1222 = vst.msk [vmem:[#allocation2] sm:$0xff] %vm1221_vm8, %v1219_v9  ;;  %v3089_v9 = vld [vmem:[%s4152_s8 + $0x30] sm:$0xff]  }
 0x6da   : > { %v1223_v10 = vld [vmem:[#allocation2] sm:$0xff] }
 0x6db   : > { %v1224_v11 = vpack.c.bf16 %v1223_v10, %v1223_v10  ;;  %v3090_v10 = vld [vmem:[%s4152_s8 + $0x38] sm:$0xff]  }
 0x6dd   : > { %2871 = vmatmul.mubr.msk.bf16.vlgmr.msra.gmra.mrb[20].mxu1 %vm407_vm0, %v1224_v11 }
 0x6de   : > { %2898 = vmatprep.mubr.msk.bf16.mxu1 %vm3255_vm1, %v3254_v8  ;;  %2883 = vmatpush3.bf16.msra.mxu1 %v3083_v38 }
 0x6df   : > { %2884 = vmatprep.subr.bf16.mxu1 %v3254_v8 }
 0x6e2   : > { %2885 = vmatpush3.bf16.msra.mxu1 %v3084_v50 }
 0x6e3   : > { %2886 = vmatprep.subr.bf16.mxu1 %v3254_v8 }
 0x6e6   : > { %2887 = vmatpush3.bf16.msra.mxu1 %v3085_v51 }
 0x6e7   : > { %2888 = vmatprep.subr.bf16.mxu1 %v3254_v8 }
 0x6ea   : > { %2889 = vmatpush3.bf16.msra.mxu1 %v3086_v55 }
 0x6eb   : > { %2890 = vmatprep.subr.bf16.mxu1 %v3254_v8 }
 0x6ee   : > { %2891 = vmatpush3.bf16.msra.mxu1 %v3087_v6  ;;  %v3092_v6 = vld [vmem:[%s4148_s4 + $0x18] sm:$0xff]  }
 0x6ef   : > { %2892 = vmatprep.subr.bf16.mxu1 %v3254_v8 }
 0x6f2   : > { %2893 = vmatpush3.bf16.msra.mxu1 %v3088_v7 }
 0x6f3   : > { %2894 = vmatprep.subr.bf16.mxu1 %v3254_v8 }
 0x6f6   : > { %2895 = vmatpush3.bf16.msra.mxu1 %v3089_v9 }
 0x6f7   : > { %2896 = vmatprep.subr.bf16.mxu1 %v3254_v8 }
 0x6fa   : > { %2897 = vmatpush3.bf16.msra.mxu1 %v3090_v10 }
 0x6fb   : > { %2928 = vmatprep.subr.bf16.mxu1 %v3254_v8 }
 0x7b0   : > { %v1278_v15 = vpop.f32.mrb[20].mxu1 }
 0x7b1   : > { %v3763_v17 = vadd.f32 %v1278_v15, %v3436_v0  ;;  %v2872_v20 = vpop.f32.mrb[21].mxu1  ;;  %v3081_v0 = vld [vmem:[%s4151_s7] sm:$0xff]  }
 0x7b2   : > { %v1281_v21 = vpop.f32.mrb[22].mxu1  ;;  %2875 = vmatpush3.bf16.msra.mxu0 %v3081_v0 }
 0x7b3   : > { %v2873_v5 = vpop.f32.mrb[23].mxu1  ;;  %v1286_v29 = vsel %vm407_vm0, %v3763_v17, 0.0  ;;  %2876 = vmatprep.subr.bf16.mxu0 %v3254_v8 }
 0x7b4   : > { %1287 = vadd.xlane.f32.xlu1 %v1286_v29 }
 0x7b6   : > { %2877 = vmatpush3.bf16.msra.mxu0 %v3082_v37 }
 0x7b7   : > { %2902 = vmatprep.subr.bf16.mxu0 %v3254_v8 }
 0x841   : > { %v1288_v31 = vpop.xlane.xlu1 %1287 }
 0x842   : > { %v1289_v32 = vmul.f32 0.03125, %v1288_v31 }
 0x844   : > { %v1290_v33 = vsub.f32 %v3763_v17, %v1289_v32 }
 0x846   : > { %v1291_v35 = vmul.f32 %v1290_v33, %v1290_v33 }
 0x848   : > { %v1292_v28 = vsel %vm407_vm0, %v1291_v35, 0.0 }
 0x849   : > { %1293 = vadd.xlane.f32.xlu0 %v1292_v28 }
 0x8d6   : > { %v1294_v14 = vpop.xlane.xlu0 %1293 }
 0x8d7   : > { %v1295_v30 = vmul.f32 0.03125, %v1294_v14 }
 0x8d9   : > { %v1296_v40 = vadd.f32 1e-05, %v1295_v30 }
 0x8db   : > { %3129 = vrsqrt.f32 %v1296_v40 }
 0x8e5   : > { %v3130_v41 = vpop.eup %3129 }
 0x8e6   : > { %v1298_v43 = vmul.f32 %v3130_v41, %v1290_v33 }
 0x8e8   : > { %v1305_v46 = vmul.f32 %v2661_v42, %v1298_v43 }
 0x8ea   : > { %v1306_v47 = vpack.c.bf16 %v1305_v46, %v1305_v46 }
 0x8ec   : > { %2879 = vmatmul.mubr.msk.bf16.vlgmr.msra.gmra.mrb[16].mxu0 %vm407_vm0, %v1306_v47 }
 0x8ed   : > { %2906 = vmatprep.mubr.msk.bf16.mxu0 %vm3255_vm1, %v3254_v8 }
 0x9bf   : > { %v1360_v11 = vpop.f32.mrb[16].mxu0 }
 0x9c0   : > { %v1367_v15 = vmul.f32 0.044715, %v1360_v11  ;;  %v2880_v20 = vpop.f32.mrb[17].mxu0  ;;  %v1366_v28 = vmul.f32 0.5, %v1360_v11 }
 0x9c1   : > { %v1363_v21 = vpop.f32.mrb[18].mxu0 }
 0x9c2   : > { %v1368_v5 = vmul.f32 %v1367_v15, %v1360_v11  ;;  %v2881_v29 = vpop.f32.mrb[19].mxu0  ;;  %v2674_v15 = vld [vmem:[%s4147_s3 + $0x1] ss:$0 sm:$0xff] }
 0x9c4   : > { %v1369_v31 = vmul.f32 %v1368_v5, %v1360_v11 }
 0x9c6   : > { %v1370_v32 = vadd.f32 %v1369_v31, %v1360_v11 }
 0x9c8   : > { %v1371_v33 = vmul.f32 0.7978846, %v1370_v32 }
 0x9ca   : > { %3131 = vtanh.f32 %v1371_v33 }
 0x9d4   : > { %v3132_v35 = vpop.eup %3131 }
 0x9d5   : > { %v1373_v0 = vadd.f32 1.0, %v3132_v35 }
 0x9d7   : > { %v1374_v37 = vmul.f32 %v1373_v0, %v1366_v28 }
 0x9d9   : > { %v1375_v38 = vpack.c.bf16 %v1374_v37, %v1374_v37 }
 0x9db   : > { %2899 = vmatmul.mubr.bf16.vlgmr.msra.gmra.mrb[24].mxu1 %v1375_v38 }
 0x9dc   : > { %2930 = vmatprep.mubr.msk.bf16.mxu1 %vm3255_vm1, %v3254_v8 }
 0xaae   : > { %v1474_v14 = vpop.f32.mrb[24].mxu1 }
 0xaaf   : > { %v3818_v30 = vadd.f32 %v1474_v14, %v3763_v17  ;;  %v2900_v40 = vpop.f32.mrb[25].mxu1  ;;  %v3091_v17 = vld [vmem:[%s4148_s4 + $0x10] sm:$0xff]  }
 0xab0   : > { %v1477_v41 = vpop.f32.mrb[26].mxu1  ;;  %2903 = vmatpush3.bf16.msra.mxu0 %v3091_v17 }
 0xab1   : > { %v2901_v42 = vpop.f32.mrb[27].mxu1  ;;  %v1483_v43 = vsel %vm407_vm0, %v3818_v30, 0.0  ;;  %2904 = vmatprep.subr.bf16.mxu0 %v3254_v8 }
 0xab2   : > { %1484 = vadd.xlane.f32.xlu0 %v1483_v43 }
 0xab4   : > { %2905 = vmatpush3.bf16.msra.mxu0 %v3092_v6 }
 0xab5   : > { %2910 = vmatprep.subr.bf16.mxu0 %v3254_v8 }
 0xb3f   : > { %v1485_v46 = vpop.xlane.xlu0 %1484 }
 0xb40   : > { %v1486_v47 = vmul.f32 0.03125, %v1485_v46 }
 0xb42   : > { %v1487_v50 = vsub.f32 %v3818_v30, %v1486_v47 }
 0xb44   : > { %v1488_v51 = vmul.f32 %v1487_v50, %v1487_v50 }
 0xb46   : > { %v1489_v55 = vsel %vm407_vm0, %v1488_v51, 0.0 }
 0xb47   : > { %1490 = vadd.xlane.f32.xlu1 %v1489_v55 }
 0xbd4   : > { %v1491_v7 = vpop.xlane.xlu1 %1490 }
 0xbd5   : > { %v1492_v9 = vmul.f32 0.03125, %v1491_v7 }
 0xbd7   : > { %v1493_v10 = vadd.f32 1e-05, %v1492_v9 }
 0xbd9   : > { %3133 = vrsqrt.f32 %v1493_v10 }
 0xbe3   : > { %v3134_v11 = vpop.eup %3133 }
 0xbe4   : > { %v1495_v20 = vmul.f32 %v3134_v11, %v1487_v50 }
 0xbe6   : > { %v1502_v21 = vmul.f32 %v2674_v15, %v1495_v20 }
 0xbe8   : > { %v1503_v5 = vpack.c.bf16 %v1502_v21, %v1502_v21 }
 0xbea   : > { %2907 = vmatmul.mubr.msk.bf16.vlgmr.msra.gmra.mrb[20].mxu0 %vm407_vm0, %v1503_v5 }
 0xbeb   : > { %2912 = vmatprep.mubr.msk.bf16.mxu0 %vm3255_vm1, %v3254_v8 }
 0xcbd   : > { %v3838_v29 = vpop.f32.mrb[20].mxu0 }
 0xcbe   : > { %v2908_v31 = vpop.f32.mrb[21].mxu0  ;;  %v1591_v32 = vmul.f32 %v3838_v29, %v3509_v23  ;;  %v1584_v33 = vmul.f32 %v3838_v29, %v3507_v22  ;;  %v1572_v0 = vmul.f32 %v3838_v29, %v3527_v34  ;;  %v1590_v37 = vmul.f32 %v3838_v29, %v3590_v56 }
 0xcbf   : > { %v1561_v35 = vpop.f32.mrb[22].mxu0  ;;  %v1583_v23 = vmul.f32 %v3838_v29, %v3592_v57  ;;  %v1571_v41 = vmul.f32 %v3838_v29, %v3471_v13  ;;  %v1565_v43 = vmul.f32 %v3838_v29, %v3596_v59  ;;  %v1742_v56 = vmul.f32 %v3838_v29, %v3511_v24 }
 0xcc0   : > { %1593 = vrot.lane.b32.xlu1 %v1591_v32, %s3270_s12  ;;  %1586 = vrot.lane.b32.xlu0 %v1584_v33, %s3270_s12  ;;  %v2909_v28 = vpop.f32.mrb[23].mxu0  ;;  %v1749_v57 = vmul.f32 %v3838_v29, %v3513_v25  ;;  %v1719_v13 = vmul.f32 %v3838_v29, %v3515_v26  ;;  %v1726_v59 = vmul.f32 %v3838_v29, %v3517_v27 }
 0xcc1   : > { %v1902_v24 = vmul.f32 %v3838_v29, %v3531_v36  ;;  %v1909_v25 = vmul.f32 %v3838_v29, %v3542_v39  ;;  %v1879_v26 = vmul.f32 %v3838_v29, %v3556_v45  ;;  %v1886_v27 = vmul.f32 %v3838_v29, %v3554_v44 }
 0xcc2   : > { %v2069_v36 = vmul.f32 %v3838_v29, %v3566_v48  ;;  %v2039_v39 = vmul.f32 %v3838_v29, %v3582_v53  ;;  %v2046_v45 = vmul.f32 %v3838_v29, %v3580_v52  ;;  %v1564_v48 = vmul.f32 %v3838_v29, %v3466_v12 }
 0xcc3   : > { %v2062_v5 = vmul.f32 %v3838_v29, %v3568_v49  ;;  %v3911_v31 = vpack.c.bf16 %v3838_v29, %v3838_v29  ;;  %v1741_v33 = vmul.f32 %v3838_v29, %v3594_v58  ;;  %v1748_v28 = vmul.f32 %v3838_v29, %v3600_v61 }
 0xcc4   : > { %1574 = vrot.lane.b32.xlu1 %v1572_v0, %s3270_s12  ;;  %v1725_v58 = vmul.f32 %v3838_v29, %v3598_v60  ;;  %v1901_v61 = vmul.f32 %v3838_v29, %v3608_v2  ;;  %v1878_v60 = vmul.f32 %v3838_v29, %v3612_v4 }
 0xd32   : > { %v1594_v38 = vpop.permute.xlu1 %1593  ;;  %v1587_v14 = vpop.permute.xlu0 %1586 }
 0xd33   : > { %v1596_v22 = vadd.f32 %v1594_v38, %v1590_v37  ;;  %v1589_v40 = vsub.f32 %v1583_v23, %v1587_v14  ;;  %v1718_v37 = vmul.f32 %v3838_v29, %v3604_v63  ;;  %v1908_v63 = vmul.f32 %v3838_v29, %v3602_v62 }
 0xd34   : > { %v2061_v62 = vmul.f32 %v3838_v29, %v3622_v16 }
 0xd35   : > { %1598 = vrot.lane.b32.xlu0 %v1589_v40, %s4188_s14  ;;  %1602 = vrot.lane.b32.xlu1 %v1596_v22, %s4189_s15  ;;  %s4199_s14 = smov 108   ;;  %s4200_s15 = smov 116  }
 0xd36   : > { %v1575_v34 = vpop.permute.xlu1 %1574 }
 0xd37   : > { %v1577_v42 = vadd.f32 %v1575_v34, %v1571_v41 }
 0xd39   : > { %1579 = vrot.lane.b32.xlu1 %v1577_v42, %s4190_s30  ;;  %1567 = vrot.lane.b32.xlu0 %v1565_v43, %s3270_s12  ;;  %s4201_s30 = smov 48  }
 0xd3d   : > { %1744 = vrot.lane.b32.xlu1 %v1742_v56, %s3270_s12 }
 0xd41   : > { %1751 = vrot.lane.b32.xlu1 %v1749_v57, %s3270_s12 }
 0xd45   : > { %1721 = vrot.lane.b32.xlu1 %v1719_v13, %s3270_s12 }
 0xd49   : > { %1728 = vrot.lane.b32.xlu1 %v1726_v59, %s3270_s12 }
 0xd4d   : > { %1904 = vrot.lane.b32.xlu1 %v1902_v24, %s3270_s12 }
 0xd51   : > { %1911 = vrot.lane.b32.xlu1 %v1909_v25, %s3270_s12  ;;  %v2068_v25 = vmul.f32 %v3838_v29, %v3610_v3  ;;  %v2045_v3 = vmul.f32 %v3838_v29, %v3658_v18 }
 0xd55   : > { %1881 = vrot.lane.b32.xlu1 %v1879_v26, %s3270_s12 }
 0xd59   : > { %1888 = vrot.lane.b32.xlu1 %v1886_v27, %s3270_s12 }
 0xd5d   : > { %2071 = vrot.lane.b32.xlu1 %v2069_v36, %s3270_s12 }
 0xd61   : > { %2041 = vrot.lane.b32.xlu1 %v2039_v39, %s3270_s12  ;;  %v2038_v39 = vmul.f32 %v3838_v29, %v3660_v19  ;;  %v1885_v19 = vmul.f32 %v3838_v29, %v3606_v1 }
 0xd65   : > { %2048 = vrot.lane.b32.xlu1 %v2046_v45, %s3270_s12 }
 0xda7   : > { %v1599_v46 = vpop.permute.xlu0 %1598  ;;  %v1603_v47 = vpop.permute.xlu1 %1602 }
 0xda8   : > { %v1605_v44 = vsel %vm515_vm2, %v1599_v46, %v1603_v47 }
 0xda9   : > { %v1607_v50 = vpack.c.bf16 %v1605_v44, %v1605_v44 }
 0xdab   : > { %v1568_v51 = vpop.permute.xlu0 %1567  ;;  %v1612_v55 = vsel %vm556_vm3, %v1607_v50, 0  ;;  %v1580_v53 = vpop.permute.xlu1 %1579 }
 0xdac   : > { %v1570_v17 = vsub.f32 %v1564_v48, %v1568_v51  ;;  %2911 = vmatpush3.bf16.xpose.msra.mxu0 %v1612_v55 }
 0xdad   : > { %2916 = vmatprep.subr.bf16.mxu0 %v3254_v8 }
 0xdae   : > { %v1582_v52 = vsel %vm515_vm2, %v1570_v17, %v1580_v53 }
 0xdaf   : > { %v1606_v6 = vpack.c.bf16 %v1582_v52, %v1582_v52  ;;  %v1745_v20 = vpop.permute.xlu1 %1744 }
 0xdb0   : > { %v1747_v35 = vsub.f32 %v1741_v33, %v1745_v20 }
 0xdb3   : > { %2913 = vmatmul.mubr.msk.bf16.vlgmr.msra.gmra.mrb[24].mxu0 %vm556_vm3, %v1606_v6  ;;  %v1752_v21 = vpop.permute.xlu1 %1751 }
 0xdb4   : > { %2918 = vmatprep.mubr.msk.bf16.mxu0 %vm3255_vm1, %v3254_v8  ;;  %v1754_v0 = vadd.f32 %v1752_v21, %v1748_v28 }
 0xdb7   : > { %v1722_v32 = vpop.permute.xlu1 %1721 }
 0xdb8   : > { %v1724_v23 = vsub.f32 %v1718_v37, %v1722_v32 }
 0xdbb   : > { %v1729_v49 = vpop.permute.xlu1 %1728 }
 0xdbc   : > { %v1731_v14 = vadd.f32 %v1729_v49, %v1725_v58 }
 0xdbf   : > { %v1905_v38 = vpop.permute.xlu1 %1904 }
 0xdc0   : > { %v1907_v40 = vsub.f32 %v1901_v61, %v1905_v38 }
 0xdc3   : > { %v1912_v22 = vpop.permute.xlu1 %1911 }
 0xdc4   : > { %v1914_v41 = vadd.f32 %v1912_v22, %v1908_v63 }
 0xdc7   : > { %v1882_v34 = vpop.permute.xlu1 %1881 }
 0xdc8   : > { %v1884_v42 = vsub.f32 %v1878_v60, %v1882_v34 }
 0xdcb   : > { %v1889_v2 = vpop.permute.xlu1 %1888 }
 0xdcc   : > { %v1891_v50 = vadd.f32 %v1889_v2, %v1885_v19 }
 0xdcf   : > { %v2072_v57 = vpop.permute.xlu1 %2071 }
 0xdd0   : > { %v2074_v27 = vadd.f32 %v2072_v57, %v2068_v25 }
 0xdd3   : > { %v2042_v4 = vpop.permute.xlu1 %2041 }
 0xdd4   : > { %v2044_v16 = vsub.f32 %v2038_v39, %v2042_v4 }
 0xdd7   : > { %v2049_v45 = vpop.permute.xlu1 %2048 }
 0xdd8   : > { %v2051_v44 = vadd.f32 %v2049_v45, %v2045_v3 }
 0xe86   : > { %v1648_v7 = vpop.f32.mrb[24].mxu0 }
 0xe87   : > { %v1654_v12 = vsel %vm3698_vm4, %v1648_v7, -1e+30  ;;  %v2914_v9 = vpop.f32.mrb[25].mxu0 }
 0xe88   : > { %v1651_v10 = vpop.f32.mrb[26].mxu0  ;;  %v1655_v11 = vsel %vm556_vm3, %v1654_v12, -inf }
 0xe89   : > { %1656 = vmax.xlane.f32.xlu0 %v1655_v11  ;;  %v2915_v15 = vpop.f32.mrb[27].mxu0 }
 0xe9f   : > { %2064 = vrot.lane.b32.xlu0 %v2062_v5, %s3270_s12 }
 0xea3   : > { %1669 = vrot.lane.b32.xlu0 %v3911_v31, %s3285_s16  ;;  %s4194_s16 = smov 80  }
 0xea7   : > { %1756 = vrot.lane.b32.xlu0 %v1747_v35, %s4191_s26  ;;  %s4202_s26 = smov 56  }
 0xeab   : > { %1760 = vrot.lane.b32.xlu0 %v1754_v0, %s4192_s13  ;;  %s4203_s13 = smov 40  }
 0xeaf   : > { %1733 = vrot.lane.b32.xlu0 %v1724_v23, %s4193_s25  ;;  %s4204_s25 = smov 8  }
 0xeb3   : > { %1737 = vrot.lane.b32.xlu0 %v1731_v14, %s3270_s12  ;;  %s4196_s12 = smov 72  }
 0xeb7   : > { %1916 = vrot.lane.b32.xlu0 %v1907_v40, %s4194_s16  ;;  %s4205_s16 = smov 16  }
 0xebb   : > { %1920 = vrot.lane.b32.xlu0 %v1914_v41, %s4195_s22 }
 0xebf   : > { %1893 = vrot.lane.b32.xlu0 %v1884_v42, %s3280_s24  ;;  %s4197_s24 = smov 76  }
 0xf16   : > { %v1657_v43 = vpop.xlane.xlu0 %1656 }
 0xf17   : > { %v1658_v56 = vsub.f32 %v1654_v12, %v1657_v43 }
 0xf19   : > { %v1659_v13 = vmul.f32 1.442695, %v1658_v56 }
 0xf1a   : > { %v2065_v59 = vpop.permute.xlu0 %2064 }
 0xf1b   : > { %3135 = vpow2.f32 %v1659_v13  ;;  %v2067_v24 = vsub.f32 %v2061_v62, %v2065_v59 }
 0xf1d   : > { %2076 = vrot.lane.b32.xlu0 %v2067_v24, %s4196_s12 }
 0xf1e   : > { %v1670_v26 = vpop.permute.xlu0 %1669 }
 0xf1f   : > { %v1675_v36 = vsel %vm623_vm5, %v1670_v26, 0 }
 0xf20   : > { %2917 = vmatpush3.bf16.msra.mxu0 %v1675_v36 }
 0xf21   : > { %2080 = vrot.lane.b32.xlu0 %v2074_v27, %s4197_s24  ;;  %2922 = vmatprep.subr.bf16.mxu0 %v3254_v8 }
 0xf22   : > { %v1757_v48 = vpop.permute.xlu0 %1756 }
 0xf25   : > { %v3136_v46 = vpop.eup %3135  ;;  %2053 = vrot.lane.b32.xlu0 %v2044_v16, %s4198_s29 }
 0xf26   : > { %v1661_v47 = vsel %vm556_vm3, %v3136_v46, 0.0  ;;  %v1761_v51 = vpop.permute.xlu0 %1760 }
 0xf27   : > { %1662 = vadd.xlane.f32.xlu1 %v1661_v47  ;;  %v1763_v6 = vsel %vm515_vm2, %v1757_v48, %v1761_v51 }
 0xf28   : > { %v1765_v9 = vpack.c.bf16 %v1763_v6, %v1763_v6 }
 0xf29   : > { %2057 = vrot.lane.b32.xlu0 %v2051_v44, %s4199_s14  ;;  %s4206_s14 = smov 24  }
 0xf2a   : > { %v1734_v55 = vpop.permute.xlu0 %1733  ;;  %v1770_v1 = vsel %vm556_vm3, %v1765_v9, 0 }
 0xf2e   : > { %v1738_v17 = vpop.permute.xlu0 %1737 }
 0xf2f   : > { %v1740_v20 = vsel %vm515_vm2, %v1734_v55, %v1738_v17 }
 0xf30   : > { %v1764_v32 = vpack.c.bf16 %v1740_v20, %v1740_v20 }
 0xf32   : > { %v1917_v53 = vpop.permute.xlu0 %1916 }
 0xf36   : > { %v1921_v52 = vpop.permute.xlu0 %1920 }
 0xf37   : > { %v1923_v29 = vsel %vm515_vm2, %v1917_v53, %v1921_v52 }
 0xf38   : > { %1897 = vrot.lane.b32.xlu1 %v1891_v50, %s4200_s15  ;;  %v1925_v21 = vpack.c.bf16 %v1923_v29, %v1923_v29 }
 0xf3a   : > { %v1894_v7 = vpop.permute.xlu0 %1893  ;;  %v1930_v35 = vsel %vm556_vm3, %v1925_v21, 0 }
 0xf8f   : > { %v2077_v11 = vpop.permute.xlu0 %2076 }
 0xf93   : > { %v2081_v5 = vpop.permute.xlu0 %2080 }
 0xf94   : > { %v2083_v28 = vsel %vm515_vm2, %v2077_v11, %v2081_v5 }
 0xf95   : > { %v2085_v37 = vpack.c.bf16 %v2083_v28, %v2083_v28 }
 0xf97   : > { %v2054_v49 = vpop.permute.xlu0 %2053  ;;  %v2090_v58 = vsel %vm556_vm3, %v2085_v37, 0 }
 0xf9b   : > { %v2058_v38 = vpop.permute.xlu0 %2057 }
 0xf9c   : > { %v2060_v14 = vsel %vm515_vm2, %v2054_v49, %v2058_v38 }
 0xf9d   : > { %v2084_v61 = vpack.c.bf16 %v2060_v14, %v2060_v14 }
 0xfb4   : > { %v1663_v18 = vpop.xlane.xlu1 %1662 }
 0xfb5   : > { %3137 = vrcp.f32 %v1663_v18 }
 0xfb8   : > { %v1898_v33 = vpop.permute.xlu1 %1897 }
 0xfb9   : > { %v1900_v0 = vsel %vm515_vm2, %v1894_v7, %v1898_v33 }
 0xfba   : > { %v1924_v23 = vpack.c.bf16 %v1900_v0, %v1900_v0 }
 0xfbf   : > { %v3138_v12 = vpop.eup %3137 }
 0xfc0   : > { %v1665_v10 = vmul.f32 %v3138_v12, %v3136_v46 }
 0xfc2   : > { %v1666_v15 = vpack.c.bf16 %v1665_v10, %v1665_v10 }
 0xfc4   : > { %2919 = vmatmul.mubr.msk.bf16.vlgmr.msra.gmra.mrb[28].mxu0 %vm556_vm3, %v1666_v15 }
 0xfc5   : > { %2923 = vmatpush3.bf16.xpose.msra.mxu0 %v1770_v1  ;;  %2924 = vmatprep.mubr.msk.bf16.mxu0 %vm3255_vm1, %v3254_v8 }
 0xfc6   : > { %2934 = vmatprep.subr.bf16.mxu0 %v3254_v8 }
 0xfcc   : > { %2925 = vmatmul.mubr.msk.bf16.vlgmr.msra.gmra.mrb[32].mxu0 %vm556_vm3, %v1764_v32 }
 0xfcd   : > { %2935 = vmatpush3.bf16.xpose.msra.mxu0 %v1930_v35  ;;  %2936 = vmatprep.mubr.msk.bf16.mxu0 %vm3255_vm1, %v3254_v8 }
 0xfce   : > { %2946 = vmatprep.subr.bf16.mxu0 %v3254_v8 }
 0xfd4   : > { %2937 = vmatmul.mubr.msk.bf16.vlgmr.msra.gmra.mrb[36].mxu0 %vm556_vm3, %v1924_v23 }
 0xfd5   : > { %2947 = vmatpush3.bf16.xpose.msra.mxu0 %v2090_v58  ;;  %2948 = vmatprep.mubr.msk.bf16.mxu0 %vm3255_vm1, %v3254_v8 }
 0xfd6   : > { %2958 = vmatprep.subr.bf16.mxu0 %v3254_v8 }
 0xfdc   : > { %2949 = vmatmul.mubr.msk.bf16.vlgmr.msra.gmra.mrb[40].mxu0 %vm556_vm3, %v2084_v61 }
 0xfdd   : > { %2962 = vmatprep.mubr.msk.bf16.mxu0 %vm3255_vm1, %v3254_v8 }
0x1097   : > { %v1711_v22 = vpop.f32.mrb[28].mxu0 }
0x1098   : > { %1717 = vst.msk [vmem:[#allocation2] sm:$0xff] %vm556_vm3, %v1711_v22  ;;  %v2920_v40 = vpop.f32.mrb[29].mxu0 }
0x1099   : > { %v1714_v63 = vpop.f32.mrb[30].mxu0  ;;  %v3093_v40 = vld [vmem:[%s4149_s5 + $0x10] sm:$0xff]  }
0x109a   : > { %v2921_v41 = vpop.f32.mrb[31].mxu0  ;;  %2959 = vmatpush3.bf16.msra.mxu0 %v3093_v40  ;;  %v3094_v63 = vld [vmem:[%s4149_s5 + $0x18] sm:$0xff]  }
0x109b   : > { %2960 = vmatprep.subr.bf16.mxu0 %v3254_v8 }
0x109e   : > { %2961 = vmatpush3.bf16.msra.mxu0 %v3094_v63  ;;  %v3105_v63 = vld [vmem:[%s4154_s10] ss:$8 sps:$4 sm:$0xff]  }
0x109f   : > { %v1806_v34 = vpop.f32.mrb[32].mxu0  ;;  %2974 = vmatprep.subr.bf16.mxu0 %v3254_v8 }
0x10a0   : > { %v1812_v60 = vsel %vm3698_vm4, %v1806_v34, -1e+30  ;;  %v2926_v42 = vpop.f32.mrb[33].mxu0 }
0x10a1   : > { %v1813_v2 = vsel %vm556_vm3, %v1812_v60, -inf  ;;  %v1809_v43 = vpop.f32.mrb[34].mxu0 }
0x10a2   : > { %1814 = vmax.xlane.f32.xlu1 %v1813_v2  ;;  %v2927_v56 = vpop.f32.mrb[35].mxu0 }
0x10a7   : > { %v1966_v57 = vpop.f32.mrb[36].mxu0 }
0x10a8   : > { %v1972_v13 = vsel %vm3698_vm4, %v1966_v57, -1e+30  ;;  %v2938_v62 = vpop.f32.mrb[37].mxu0 }
0x10a9   : > { %v1973_v59 = vsel %vm556_vm3, %v1972_v13, -inf  ;;  %v1969_v24 = vpop.f32.mrb[38].mxu0 }
0x10aa   : > { %1974 = vmax.xlane.f32.xlu0 %v1973_v59  ;;  %v2939_v25 = vpop.f32.mrb[39].mxu0 }
0x10af   : > { %v2126_v4 = vpop.f32.mrb[40].mxu0 }
0x10b0   : > { %v2132_v26 = vsel %vm3698_vm4, %v2126_v4, -1e+30  ;;  %v2950_v27 = vpop.f32.mrb[41].mxu0 }
0x10b1   : > { %v2133_v36 = vsel %vm556_vm3, %v2132_v26, -inf  ;;  %v2129_v39 = vpop.f32.mrb[42].mxu0 }
0x10b2   : > { %2134 = vmax.xlane.f32.xlu0 %v2133_v36  ;;  %v2951_v16 = vpop.f32.mrb[43].mxu0 }
0x112f   : > { %v1815_v45 = vpop.xlane.xlu1 %1814 }
0x1130   : > { %v1816_v46 = vsub.f32 %v1812_v60, %v1815_v45 }
0x1132   : > { %v1817_v3 = vmul.f32 1.442695, %v1816_v46  ;;  %v3096_v46 = vld [vmem:[%s4151_s7 + $0x18] sm:$0xff]  }
0x1134   : > { %3139 = vpow2.f32 %v1817_v3  ;;  %v3097_v3 = vld [vmem:[%s4152_s8 + $0x40] sm:$0xff]  }
0x1137   : > { %v1975_v47 = vpop.xlane.xlu0 %1974 }
0x1138   : > { %v1976_v44 = vsub.f32 %v1972_v13, %v1975_v47 }
0x113a   : > { %v1977_v19 = vmul.f32 1.442695, %v1976_v44 }
0x113c   : > { %3141 = vpow2.f32 %v1977_v19 }
0x113e   : > { %v3140_v50 = vpop.eup %3139 }
0x113f   : > { %v1819_v48 = vsel %vm556_vm3, %v3140_v50, 0.0  ;;  %v2135_v55 = vpop.xlane.xlu0 %2134 }
0x1140   : > { %1820 = vadd.xlane.f32.xlu1 %v1819_v48  ;;  %v2136_v17 = vsub.f32 %v2132_v26, %v2135_v55  ;;  %v2698_v48 = vld [vmem:[%s4150_s6 + $0x1] ss:$0 sm:$0xff] }
0x1142   : > { %v2137_v53 = vmul.f32 1.442695, %v2136_v17  ;;  %v3098_v17 = vld [vmem:[%s4152_s8 + $0x48] sm:$0xff]  }
0x1144   : > { %3143 = vpow2.f32 %v2137_v53  ;;  %v3099_v53 = vld [vmem:[%s4152_s8 + $0x50] sm:$0xff]  }
0x1146   : > { %v3142_v54 = vpop.eup %3141 }
0x1147   : > { %v1979_v51 = vsel %vm556_vm3, %v3142_v54, 0.0 }
0x1148   : > { %1980 = vadd.xlane.f32.xlu0 %v1979_v51 }
0x114e   : > { %v3144_v18 = vpop.eup %3143 }
0x114f   : > { %v2139_v52 = vsel %vm556_vm3, %v3144_v18, 0.0 }
0x1151   : > { %1985 = vrot.lane.b32.xlu1 %v3911_v31, %s4201_s30 }
0x115e   : > { %1825 = vrot.lane.b32.xlu0 %v3911_v31, %s4202_s26 }
0x1175   : > { %2140 = vadd.xlane.f32.xlu1 %v2139_v52  ;;  %v3101_v52 = vld [vmem:[%s4152_s8 + $0x60] sm:$0xff]  }
0x1186   : > { %2145 = vrot.lane.b32.xlu1 %v3911_v31, %s4203_s13  ;;  %s2741_s13 = sshll.u32 %s3369_s21, 8  ;;  %s3287_s21 = smov [#allocation6]  }
0x1187   : > { %s4104_s22 = scalar_lea.hbm %s4155_s11, %s2741_s13  ;;  %s3189_s29 = sshll.u32 %s3287_s21, 4  ;;  %s3190_s29 = int_to_ptr.vmem [resolvable:$false] %s3189_s29 }
0x11cd   : > { %v1821_v6 = vpop.xlane.xlu1 %1820 }
0x11ce   : > { %3145 = vrcp.f32 %v1821_v6  ;;  %v3102_v6 = vld [vmem:[%s4152_s8 + $0x68] sm:$0xff]  }
0x11d1   : > { %v1986_v15 = vpop.permute.xlu1 %1985 }
0x11d2   : > { %v1991_v29 = vsel %vm623_vm5, %v1986_v15, 0 }
0x11d5   : > { %v1981_v7 = vpop.xlane.xlu0 %1980 }
0x11d6   : > { %3147 = vrcp.f32 %v1981_v7  ;;  %v3103_v7 = vld [vmem:[%s4152_s8 + $0x70] sm:$0xff]  }
0x11d8   : > { %v3146_v12 = vpop.eup %3145 }
0x11d9   : > { %v1823_v9 = vmul.f32 %v3146_v12, %v3140_v50  ;;  %v1826_v10 = vpop.permute.xlu0 %1825  ;;  %v3104_v12 = vld [vmem:[%s4152_s8 + $0x78] sm:$0xff]  }
0x11da   : > { %v1831_v11 = vsel %vm623_vm5, %v1826_v10, 0 }
0x11db   : > { %2929 = vmatpush3.bf16.msra.mxu1 %v1831_v11  ;;  %v1824_v1 = vpack.c.bf16 %v1823_v9, %v1823_v9 }
0x11dc   : > { %2940 = vmatprep.subr.bf16.mxu1 %v3254_v8 }
0x11de   : > { %2931 = vmatmul.mubr.msk.bf16.vlgmr.msra.gmra.mrb[28].mxu1 %vm556_vm3, %v1824_v1 }
0x11df   : > { %2941 = vmatpush3.bf16.msra.mxu1 %v1991_v29  ;;  %2942 = vmatprep.mubr.msk.bf16.mxu1 %vm3255_vm1, %v3254_v8 }
0x11e0   : > { %v3148_v31 = vpop.eup %3147  ;;  %2952 = vmatprep.subr.bf16.mxu1 %v3254_v8 }
0x11e1   : > { %v1983_v20 = vmul.f32 %v3148_v31, %v3142_v54 }
0x11e3   : > { %v1984_v21 = vpack.c.bf16 %v1983_v20, %v1983_v20 }
0x11e6   : > { %2943 = vmatmul.mubr.msk.bf16.vlgmr.msra.gmra.mrb[32].mxu1 %vm556_vm3, %v1984_v21 }
0x11e7   : > { %2954 = vmatprep.mubr.msk.bf16.mxu1 %vm3255_vm1, %v3254_v8 }
0x1202   : > { %v2141_v5 = vpop.xlane.xlu1 %2140 }
0x1203   : > { %3149 = vrcp.f32 %v2141_v5 }
0x1206   : > { %v2146_v32 = vpop.permute.xlu1 %2145 }
0x1207   : > { %v2151_v33 = vsel %vm623_vm5, %v2146_v32, 0 }
0x1208   : > { %2953 = vmatpush3.bf16.msra.mxu1 %v2151_v33 }
0x1209   : > { %2966 = vmatprep.subr.bf16.mxu1 %v3254_v8 }
0x120d   : > { %v3150_v35 = vpop.eup %3149 }
0x120e   : > { %v2143_v28 = vmul.f32 %v3150_v35, %v3144_v18  ;;  %v3100_v18 = vld [vmem:[%s4152_s8 + $0x58] sm:$0xff]  }
0x1210   : > { %v2144_v49 = vpack.c.bf16 %v2143_v28, %v2143_v28 }
0x1212   : > { %2955 = vmatmul.mubr.msk.bf16.vlgmr.msra.gmra.mrb[36].mxu1 %vm556_vm3, %v2144_v49 }
0x1213   : > { %2970 = vmatprep.mubr.msk.bf16.mxu1 %vm3255_vm1, %v3254_v8 }
0x12b1   : > { %v1867_v0 = vpop.f32.mrb[28].mxu1 }
0x12b2   : > { %1874 = vrot.lane.b32.xlu0 %v1867_v0, %s4204_s25  ;;  %v2932_v37 = vpop.f32.mrb[29].mxu1 }
0x12b3   : > { %v1870_v23 = vpop.f32.mrb[30].mxu1 }
0x12b4   : > { %v2933_v38 = vpop.f32.mrb[31].mxu1 }
0x12b9   : > { %v2027_v58 = vpop.f32.mrb[32].mxu1 }
0x12ba   : > { %2034 = vrot.lane.b32.xlu1 %v2027_v58, %s4205_s16  ;;  %v2944_v14 = vpop.f32.mrb[33].mxu1 }
0x12bb   : > { %v2030_v61 = vpop.f32.mrb[34].mxu1 }
0x12bc   : > { %v2945_v22 = vpop.f32.mrb[35].mxu1 }
0x12e5   : > { %v2187_v41 = vpop.f32.mrb[36].mxu1 }
0x12e6   : > { %2194 = vrot.lane.b32.xlu0 %v2187_v41, %s4206_s14  ;;  %v2956_v34 = vpop.f32.mrb[37].mxu1  ;;  %v3107_v41 = vld [vmem:[%s4154_s10 + $0x4] ss:$8 sps:$4 sm:$0xff]   ;;  %s388_s14 = sand.u32 1, %s3243_s18  }
0x12e7   : > { %v2190_v60 = vpop.f32.mrb[38].mxu1  ;;  %v3110_v34 = vld [vmem:[%s4154_s10 + $0x14] ss:$8 sps:$4 sm:$0xff]   ;;  %s2644_s15 = sshll.u32 %s388_s14, 4  ;;  %s2553_s12 = scalar_lea.sflag [#allocation5], %s388_s14 }
0x12e8   : > { %v2957_v42 = vpop.f32.mrb[39].mxu1  ;;  %v3286_v60 = vmov 0   ;;  %s390_s30 = scalar_lea.vmem [#allocation6], %s2644_s15  ;;  %s3191_s15 = scalar_lea.vmem %s3190_s29, 512 }
0x12e9   : > { %v3108_v42 = vld [vmem:[%s4154_s10 + $0x10] ss:$8 sps:$4 sm:$0xff]   ;;  %s2567_s26 = sshll.u32 %s390_s30, 4  ;;  %s4099_s26 = int_to_ptr.vmem [resolvable:$true] %s2567_s26 }
0x12ea   : > { %s3185_s24 = scalar_lea.vmem %s4099_s26, 256  ;;  %p3192_p2 = scmp.lt.s32.totalorder %s4099_s26, %s3190_s29 }
0x12eb   : > { %p3186_p5 = scmp.ne.s32.totalorder %s4099_s26, %s3185_s24  ;;  %p3193_p3 = scmp.lt.s32.totalorder %s3191_s15, %s3185_s24 }
0x12ed   : > { %p3187_p10 = pnand %p3186_p5, %p4207_p9  ;;  %p3194_p4 = por %p3193_p3, %p3192_p2 }
0x12ef   : > { %p3188_p12 = pneg %p3187_p10 }
0x12f1   : > { %p3195_p7 = pnand %p3194_p4, %p3188_p12 }
0x1324   : > { %v1875_v2 = vpop.permute.xlu0 %1874 }
0x1325   : > { %1877 = vst.msk [vmem:[#allocation2] sm:$0xff] %vm851_vm6, %v1875_v2 }
0x132c   : > { %v2035_v43 = vpop.permute.xlu1 %2034 }
0x132d   : > { %2037 = vst.msk [vmem:[#allocation2] sm:$0xff] %vm1036_vm7, %v2035_v43 }
0x1358   : > { %v2195_v56 = vpop.permute.xlu0 %2194 }
0x1359   : > { %2197 = vst.msk [vmem:[#allocation2] sm:$0xff] %vm1221_vm8, %v2195_v56 }
0x1360   : > { %v2198_v57 = vld [vmem:[#allocation2] sm:$0xff] }
0x1361   : > { %v2199_v13 = vpack.c.bf16 %v2198_v57, %v2198_v57 }
0x1363   : > { %2963 = vmatmul.mubr.msk.bf16.vlgmr.msra.gmra.mrb[44].mxu0 %vm407_vm0, %v2199_v13  ;;  %v2730_v13 = vld [vmem:[%s4153_s9] ss:$0 sm:$0xff] }
0x1364   : > { %2990 = vmatprep.mubr.msk.bf16.mxu0 %vm3255_vm1, %v3254_v8  ;;  %2975 = vmatpush3.bf16.msra.mxu0 %v3097_v3 }
0x1365   : > { %2976 = vmatprep.subr.bf16.mxu0 %v3254_v8 }
0x1368   : > { %2977 = vmatpush3.bf16.msra.mxu0 %v3098_v17 }
0x1369   : > { %2978 = vmatprep.subr.bf16.mxu0 %v3254_v8 }
0x136c   : > { %2979 = vmatpush3.bf16.msra.mxu0 %v3099_v53 }
0x136d   : > { %2980 = vmatprep.subr.bf16.mxu0 %v3254_v8 }
0x1370   : > { %2981 = vmatpush3.bf16.msra.mxu0 %v3100_v18 }
0x1371   : > { %2982 = vmatprep.subr.bf16.mxu0 %v3254_v8 }
0x1374   : > { %2983 = vmatpush3.bf16.msra.mxu0 %v3101_v52 }
0x1375   : > { %2984 = vmatprep.subr.bf16.mxu0 %v3254_v8 }
0x1378   : > { %2985 = vmatpush3.bf16.msra.mxu0 %v3102_v6 }
0x1379   : > { %2986 = vmatprep.subr.bf16.mxu0 %v3254_v8 }
0x137c   : > { %2987 = vmatpush3.bf16.msra.mxu0 %v3103_v7 }
0x137d   : > { %2988 = vmatprep.subr.bf16.mxu0 %v3254_v8 }
0x1380   : > { %2989 = vmatpush3.bf16.msra.mxu0 %v3104_v12 }
0x1436   : > { %v2254_v62 = vpop.f32.mrb[44].mxu0 }
0x1437   : > { %v4030_v59 = vadd.f32 %v2254_v62, %v3818_v30  ;;  %v2964_v24 = vpop.f32.mrb[45].mxu0  ;;  %v3095_v30 = vld [vmem:[%s4151_s7 + $0x10] sm:$0xff]  }
0x1438   : > { %v2257_v25 = vpop.f32.mrb[46].mxu0  ;;  %2967 = vmatpush3.bf16.msra.mxu1 %v3095_v30 }
0x1439   : > { %v2965_v4 = vpop.f32.mrb[47].mxu0  ;;  %v2263_v26 = vsel %vm407_vm0, %v4030_v59, 0.0  ;;  %2968 = vmatprep.subr.bf16.mxu1 %v3254_v8 }
0x143a   : > { %2264 = vadd.xlane.f32.xlu1 %v2263_v26 }
0x143c   : > { %2969 = vmatpush3.bf16.msra.mxu1 %v3096_v46 }
0x143d   : > { %2509 = vmatprep.subr.bf16.mxu1 %v3107_v41 }
0x14c7   : > { %v2265_v27 = vpop.xlane.xlu1 %2264 }
0x14c8   : > { %v2266_v36 = vmul.f32 0.03125, %v2265_v27 }
0x14ca   : > { %v2267_v39 = vsub.f32 %v4030_v59, %v2266_v36 }
0x14cc   : > { %v2268_v16 = vmul.f32 %v2267_v39, %v2267_v39 }
0x14ce   : > { %v2269_v45 = vsel %vm407_vm0, %v2268_v16, 0.0 }
0x14cf   : > { %2270 = vadd.xlane.f32.xlu0 %v2269_v45 }
0x155c   : > { %v2271_v47 = vpop.xlane.xlu0 %2270 }
0x155d   : > { %v2272_v44 = vmul.f32 0.03125, %v2271_v47 }
0x155f   : > { %v2273_v19 = vadd.f32 1e-05, %v2272_v44 }
0x1561   : > { %3151 = vrsqrt.f32 %v2273_v19 }
0x156b   : > { %v3152_v50 = vpop.eup %3151 }
0x156c   : > { %v2275_v54 = vmul.f32 %v3152_v50, %v2267_v39 }
0x156e   : > { %v2282_v51 = vmul.f32 %v2698_v48, %v2275_v54 }
0x1570   : > { %v2283_v55 = vpack.c.bf16 %v2282_v51, %v2282_v51 }
0x1572   : > { %2971 = vmatmul.mubr.msk.bf16.vlgmr.msra.gmra.mrb[40].mxu1 %vm407_vm0, %v2283_v55 }
0x1573   : > { %2541 = vmatprep.mubr.bf16.mxu1 %v3286_v60  ;;  %2510 = vmatpush1.bf16.msra.mxu1 %v3105_v63 }
0x1574   : > { %2511 = vmatprep.subr.bf16.mxu1 %v3110_v34 }
0x1577   : > { %2512 = vmatpush1.bf16.msra.mxu1 %v3108_v42 }
0x1645   : > { %v2338_v9 = vpop.f32.mrb[40].mxu1 }
0x1646   : > { %v2345_v10 = vmul.f32 0.044715, %v2338_v9  ;;  %v2972_v11 = vpop.f32.mrb[41].mxu1  ;;  %v2344_v32 = vmul.f32 0.5, %v2338_v9 }
0x1647   : > { %v2341_v15 = vpop.f32.mrb[42].mxu1 }
0x1648   : > { %v2346_v1 = vmul.f32 %v2345_v10, %v2338_v9  ;;  %v2973_v29 = vpop.f32.mrb[43].mxu1 }
0x164a   : > { %v2347_v31 = vmul.f32 %v2346_v1, %v2338_v9 }
0x164c   : > { %v2348_v20 = vadd.f32 %v2347_v31, %v2338_v9 }
0x164e   : > { %v2349_v21 = vmul.f32 0.7978846, %v2348_v20 }
0x1650   : > { %3153 = vtanh.f32 %v2349_v21 }
0x165a   : > { %v3154_v5 = vpop.eup %3153 }
0x165b   : > { %v2351_v33 = vadd.f32 1.0, %v3154_v5 }
0x165d   : > { %v2352_v35 = vmul.f32 %v2351_v33, %v2344_v32 }
0x165f   : > { %v2353_v28 = vpack.c.bf16 %v2352_v35, %v2352_v35 }
0x1661   : > { %2991 = vmatmul.mubr.bf16.vlgmr.msra.gmra.mrb[48].mxu0 %v2353_v28 }
0x1734   : > { %v2453_v49 = vpop.f32.mrb[48].mxu0 }
0x1735   : > { %v2459_v8 = vadd.f32 %v2453_v49, %v4030_v59  ;;  %v2992_v0 = vpop.f32.mrb[49].mxu0 }
0x1736   : > { %v2456_v37 = vpop.f32.mrb[50].mxu0 }
0x1737   : > { %v2993_v23 = vpop.f32.mrb[51].mxu0  ;;  %v2461_v38 = vsel %vm407_vm0, %v2459_v8, 0.0 }
0x1738   : > { %2462 = vadd.xlane.f32.xlu0 %v2461_v38 }
0x17c5   : > { %v2463_v58 = vpop.xlane.xlu0 %2462 }
0x17c6   : > { %v2464_v14 = vmul.f32 0.03125, %v2463_v58 }
0x17c8   : > { %v2465_v61 = vsub.f32 %v2459_v8, %v2464_v14 }
0x17ca   : > { %v2466_v22 = vmul.f32 %v2465_v61, %v2465_v61 }
0x17cc   : > { %v2467_v40 = vsel %vm407_vm0, %v2466_v22, 0.0 }
0x17cd   : > { %2468 = vadd.xlane.f32.xlu1 %v2467_v40 }
0x185a   : > { %v2469_v2 = vpop.xlane.xlu1 %2468 }
0x185b   : > { %v2470_v43 = vmul.f32 0.03125, %v2469_v2 }
0x185d   : > { %v2471_v56 = vadd.f32 1e-05, %v2470_v43 }
0x185f   : > { %3155 = vrsqrt.f32 %v2471_v56 }
0x1869   : > { %v3156_v57 = vpop.eup %3155 }
0x186a   : > { %v2473_v62 = vmul.f32 %v3156_v57, %v2465_v61 }
0x186c   : > { %v2480_v59 = vmul.f32 %v2730_v13, %v2473_v62 }
0x186e   : > { %v2481_v24 = vpack.c.bf16 %v2480_v59, %v2480_v59 }
0x1870   : > { %2735 = vmatmul.mubr.msk.bf16.vlgmr.msra.gmra.mrb[44].mxu1 %vm407_vm0, %v2481_v24 }
0x1943   : > { %v2543_v25 = vpop.f32.mrb[44].mxu1 }
0x1944   : > { %2550 = vst [vmem:[%s390_s30] sm:$0xff] %v2543_v25  ;;  %v2545_v4 = vpop.f32.mrb[45].mxu1 }
0x1945   : > { %2551 = vst [vmem:[%s390_s30 + $0x8] sm:$0xff] %v2545_v4  ;;  %v2547_v26 = vpop.f32.mrb[46].mxu1 }
0x1946   : > { %v2548_v27 = vpop.f32.mrb[47].mxu1 }
0x1947   : > { %3198 = shalt.err (!%p3195_p7)
}
0x1948   : > { %s3199_s14 = scalar_lea.hbm %s4104_s22, 256  ;;  %s3203_s25 = scalar_lea.hbm %s4155_s11, 512 }
0x1949   : > { %p3200_p8 = scmp.ne.s32.totalorder %s4104_s22, %s3199_s14  ;;  %p3204_p1 = scmp.lt.u32.totalorder %s4104_s22, %s4155_s11 }
0x194a   : > { %p3205_p0 = scmp.lt.u32.totalorder %s3203_s25, %s3199_s14  ;;  %p3207_p5 = scmp.lt.u32.totalorder %s3199_s14, %s4104_s22 }
0x194b   : > { %p3201_p11 = pnand %p3200_p8, %p4207_p9 }
0x194c   : > { %p3206_p6 = por %p3205_p0, %p3204_p1 }
0x194d   : > { %p3202_p13 = pneg %p3201_p11 }
0x194e   : > { %p3208_p10 = por %p3207_p5, %p3206_p6 }
0x1950   : > { %p3209_p12 = pnand %p3208_p10, %p3202_p13 }
0x1952   : > { %3212 = shalt.err (!%p3209_p12)
}
0x1953   : > { %2998 = dma.vmem_to_hbm [thread:$0]  (%p4207_p9), %s4099_s26, 256, %s4104_s22, %s2553_s12  }
0x1954 PF: > { %p3010_p2 = scmp.ge.s32.totalorder %s3251_s20, 2  ;;  %s2579_s24 = sand.u32 1, %s3239_s17  }
0x1955   : > { %p4208_p3 = scmp.ne.s32.totalorder %s4180_s28, 0  ;;  %s2580_s29 = scalar_lea.sflag [#allocation5], %s2579_s24 }
0x1957   : > { %p3005_p4 = pnand %p3010_p2, %p4208_p3 }
0x1959   : > { %3234 = dma.done.wait (!%p3005_p4), %s2580_s29, 256  }
0x195a   : > { %3236 = vsyncadd (!%p3005_p4), %s2580_s29, 4294967040  ;;  %s4209_s15 = sld [smem:[#allocation9_spill]]  ;;  %p22_p7 = scmp.ge.s32.totalorder %s3373_s23, 4  }
0x195b   : > { %s4210_s17 = smov %s3243_s18  ;;  %s4211_s18 = smov %s3247_s19 }
0x195c   : > { %s4213_s20 = smov %s3373_s23  ;;  %24 = sbr.rel (!%p22_p7) target bundleno = 4 (0x4), region = 110 }
0x1960   : > { %s4212_s19 = smov %s4209_s15 }
0x1963   :  { %2585 = vsyncpa [#allocation4], 1 }
0x1964   :  { %2587 = vsyncpa [#allocation4 + $0x1], 1 }
0x1965   :  { %2588 = vsyncpa [#allocation5], 1 }
0x1966   :  { %2590 = vsyncpa [#allocation5 + $0x1], 1 }

</bundles_post_ra>
